<compile_context>
chip_gen: v7x
topology: tpu7x:2x2x1
jax: 0.10.0
libtpu: 0.0.40
codegen_flags: <defaults>
</compile_context>

<pallas_src>
import jax
import jax.numpy as jnp
from jax import lax
from jax.experimental import pallas as pl
from jax.experimental.pallas import tpu as pltpu

INPUT_SIZE = 784                     # 28 * 28
NUM_CLASSES = 10
PADDED_CLASSES = 128                 # lane-dense output width
TB_MAX = 4096                        # batch-tile rows (x tile ~12.3 MiB f32)
VMEM_LIMIT_BYTES = 48 * 1024 * 1024  # > 16/32 MiB defaults, < v7x 64 MiB/TC


def linear_kernel(x_ref, w_ref, b_ref, o_ref):
    # x_ref: (TB, 784), w_ref: (784, 128), b_ref: (1, 128), o_ref: (TB, 128)
    acc = jnp.dot(
        x_ref[...],
        w_ref[...],
        preferred_element_type=jnp.float32,
        precision=lax.Precision.HIGHEST,
    )
    o_ref[...] = (acc + b_ref[...]).astype(o_ref.dtype)


def _round_up(x, m):
    return ((x + m - 1) // m) * m


def mnist_model_forward(xb, w_t, b):
    """xb: (B, 1, 28, 28) float32; w_t: (784, 10); b: (10,) -> (B, 10)."""
    x2d = xb.reshape(-1, INPUT_SIZE)            # glue: reshape in JAX
    B = x2d.shape[0]

    # Pad rows only to the 8-row sublane multiple (<= 7 junk rows); never to
    # a full tile.  Partial last grid block is handled (masked) by Pallas.
    B_pad8 = _round_up(B, 8)
    if B_pad8 != B:
        x2d = jnp.pad(x2d, ((0, B_pad8 - B), (0, 0)))

    TB = min(TB_MAX, B_pad8)                    # multiple of 8 by construction
    grid = (pl.cdiv(B_pad8, TB),)

    # Lane-dense weight / bias: pad classes 10 -> 128.
    w_p = jnp.pad(w_t, ((0, 0), (0, PADDED_CLASSES - NUM_CLASSES)))
    b_p = jnp.pad(b.reshape(1, NUM_CLASSES),
                  ((0, 0), (0, PADDED_CLASSES - NUM_CLASSES)))

    out = pl.pallas_call(
        linear_kernel,
        out_shape=jax.ShapeDtypeStruct((B_pad8, PADDED_CLASSES), jnp.float32),
        grid_spec=pl.GridSpec(
            grid=grid,
            in_specs=[
                # x: one batch tile per grid step (double-buffered by Pallas).
                pl.BlockSpec((TB, INPUT_SIZE), lambda i: (i, 0)),
                # weight / bias: constant block -> stays resident in VMEM.
                pl.BlockSpec((INPUT_SIZE, PADDED_CLASSES), lambda i: (0, 0)),
                pl.BlockSpec((1, PADDED_CLASSES), lambda i: (0, 0)),
            ],
            out_specs=pl.BlockSpec((TB, PADDED_CLASSES), lambda i: (i, 0)),
        ),
        compiler_params=pltpu.CompilerParams(
            dimension_semantics=("parallel",),
            vmem_limit_bytes=VMEM_LIMIT_BYTES,
        ),
        cost_estimate=pl.CostEstimate(
            flops=2 * B_pad8 * INPUT_SIZE * PADDED_CLASSES,
            transcendentals=0,
            bytes_accessed=(B_pad8 * INPUT_SIZE * 4
                            + INPUT_SIZE * PADDED_CLASSES * 4
                            + B_pad8 * PADDED_CLASSES * 4),
        ),
    )(x2d, w_p, b_p)

    # Crop padded rows/classes; rows >= B (garbage from the partial tile, if
    # any) are dropped here -- never consume the padded region.
    return lax.slice(out, (0, 0), (B, NUM_CLASSES))


def init_params(key):
    # Match nn.Linear default init: U(-1/sqrt(in), 1/sqrt(in)); stored as
    # (in, out) = W^T so the kernel does x @ w_t directly.
    kw, kb = jax.random.split(key)
    bound = 1.0 / jnp.sqrt(jnp.float32(INPUT_SIZE))
    w_t = jax.random.uniform(
        kw, (INPUT_SIZE, NUM_CLASSES), jnp.float32, minval=-bound, maxval=bound
    )
    b = jax.random.uniform(
        kb, (NUM_CLASSES,), jnp.float32, minval=-bound, maxval=bound
    )
    return w_t, b


if __name__ == "__main__":
    key = jax.random.PRNGKey(0)
    k_x, k_p = jax.random.split(key)

    # Small batch of MNIST-shaped inputs (NCHW): (B, 1, 28, 28)
    B = 8
    xb = jax.random.normal(k_x, (B, 1, 28, 28), dtype=jnp.float32)
    w_t, b = init_params(k_p)

    out = jax.block_until_ready(mnist_model_forward(xb, w_t, b))

    # Sanity check against plain-JAX reference (same precision as the kernel).
    ref = jnp.dot(xb.reshape(-1, INPUT_SIZE), w_t,
                  precision=lax.Precision.HIGHEST) + b
    assert out.shape == (B, NUM_CLASSES)
    assert jnp.allclose(out, ref, atol=1e-5, rtol=1e-5)

    print("KERNEL_OK")
</pallas_src>

<mosaic_0001>
module attributes {stable_mosaic.version = 11 : i64} {
  func.func @linear_kernel(%arg0: i32, %arg1: memref<8x784xf32, #tpu.memory_space<vmem>>, %arg2: memref<784x128xf32, #tpu.memory_space<vmem>>, %arg3: memref<1x128xf32, #tpu.memory_space<vmem>>, %arg4: memref<8x128xf32, #tpu.memory_space<vmem>>) attributes {dimension_semantics = [#tpu.dimension_semantics<parallel>], iteration_bounds = array<i64: 1>, scalar_prefetch = 0 : i64, scratch_operands = 0 : i64, tpu.core_type = #tpu.core_type<tc>, window_params = [{transform_indices = @transform_0, window_bounds = array<i64: 8, 784>}, {pipeline_mode = #tpu.pipeline_mode<synchronous>, transform_indices = @transform_1, window_bounds = array<i64: 784, 128>}, {pipeline_mode = #tpu.pipeline_mode<synchronous>, transform_indices = @transform_2, window_bounds = array<i64: 1, 128>}, {transform_indices = @transform_3, window_bounds = array<i64: 8, 128>}]} {
    %c0 = arith.constant 0 : index
    %c0_0 = arith.constant 0 : index
    %0 = vector.load %arg1[%c0, %c0_0] : memref<8x784xf32, #tpu.memory_space<vmem>>, vector<8x784xf32>
    %c0_1 = arith.constant 0 : index
    %c0_2 = arith.constant 0 : index
    %1 = vector.load %arg2[%c0_1, %c0_2] : memref<784x128xf32, #tpu.memory_space<vmem>>, vector<784x128xf32>
    %cst = arith.constant dense<0.000000e+00> : vector<8x128xf32>
    %2 = tpu.matmul %0, %1, %cst {dimension_numbers = #tpu.dot_dimension_numbers<[1], [0], [0], [1], [0, 0, 1, 1], [], []>, precision = #tpu.contract_precision<fp32>} : vector<8x784xf32>, vector<784x128xf32>, vector<8x128xf32> -> vector<8x128xf32>
    %c0_3 = arith.constant 0 : index
    %c0_4 = arith.constant 0 : index
    %3 = vector.load %arg3[%c0_3, %c0_4] : memref<1x128xf32, #tpu.memory_space<vmem>>, vector<1x128xf32>
    %4 = vector.broadcast %3 : vector<1x128xf32> to vector<8x128xf32>
    %5 = arith.addf %2, %4 : vector<8x128xf32>
    %c0_5 = arith.constant 0 : index
    %c0_6 = arith.constant 0 : index
    %6 = vector.load %arg4[%c0_5, %c0_6] : memref<8x128xf32, #tpu.memory_space<vmem>>, vector<8x128xf32>
    tpu.vector_store %arg4[%c0_5, %c0_6], %5 {strides = array<i32>} : memref<8x128xf32, #tpu.memory_space<vmem>>, vector<8x128xf32>,
    return
  }
  func.func @transform_0(%arg0: i32) -> (i32, i32) {
    %c0_i32 = arith.constant 0 : i32
    %c0_i32_0 = arith.constant 0 : i32
    return %arg0, %c0_i32 : i32, i32
  }
  func.func @transform_1(%arg0: i32) -> (i32, i32) {
    %c0_i32 = arith.constant 0 : i32
    %c0_i32_0 = arith.constant 0 : i32
    %c0_i32_1 = arith.constant 0 : i32
    return %c0_i32, %c0_i32_0 : i32, i32
  }
  func.func @transform_2(%arg0: i32) -> (i32, i32) {
    %c0_i32 = arith.constant 0 : i32
    %c0_i32_0 = arith.constant 0 : i32
    %c0_i32_1 = arith.constant 0 : i32
    return %c0_i32, %c0_i32_0 : i32, i32
  }
  func.func @transform_3(%arg0: i32) -> (i32, i32) {
    %c0_i32 = arith.constant 0 : i32
    %c0_i32_0 = arith.constant 0 : i32
    return %arg0, %c0_i32 : i32, i32
  }
}

</mosaic_0001>

<bundles_post_ra>
// kernel: tpu_custom_call.1
= control target key start
LH: loop header
LB: loop body
LE: loop exit
PB: predicated region body
PF: predicated region fallthrough
CT: control target
= control target key end

     0   :  { %8 = vsyncpa [#allocation3], 0  ;;  %s5998_s0 = inlined_call_operand.hbm [shape: f32[8,784], index: 0, kind: input, shape index: {}]   ;;  %s5999_s1 = inlined_call_operand.hbm [shape: f32[784,128], index: 1, kind: input, shape index: {}]   ;;  %s6000_s2 = inlined_call_operand.vmem [shape: f32[1,128], index: 2, kind: input, shape index: {}]   ;;  %s6001_s3 = inlined_call_operand.hbm [shape: f32[8,128], index: 3, kind: output, shape index: {}]  }
   0x1   :  { %9 = vsyncpa [#allocation6], 0 }
   0x2   :  { %10 = vsyncpa [#allocation4], 0  ;;  %s4594_s12 = smov [#allocation2]   ;;  %s4595_s14 = smov [#allocation5]  }
   0x3   :  { %s17_s13 = sshll.u32 %s4594_s12, 4  ;;  %s26_s15 = sshll.u32 %s4595_s14, 4  ;;  %s18_s13 = int_to_ptr.vmem [resolvable:$true] %s17_s13  ;;  %s4622_s15 = int_to_ptr.vmem [resolvable:$true] %s26_s15 }
   0x4   :  { %s4522_s18 = scalar_lea.hbm %s5998_s0, 896 }
   0x5   :  { %p4523_p0 = scmp.ne.s32.totalorder %s5998_s0, %s4522_s18  ;;  %p4526_p1 = scmp.lt.u32.totalorder %s4522_s18, %s5998_s0 }
   0x7   :  { %p4528_p2 = pnand %p4526_p1, %p4523_p0 }
   0x9   :  { %4531 = shalt.err (!%p4528_p2)
}
   0xa   :  { %s4532_s23 = scalar_lea.vmem %s18_s13, 896  ;;  %p4537_p4 = scmp.lt.s32.totalorder %s18_s13, %s18_s13 }
   0xb   :  { %p4533_p3 = scmp.ne.s32.totalorder %s18_s13, %s4532_s23  ;;  %p4538_p5 = scmp.lt.s32.totalorder %s4532_s23, %s4532_s23 }
   0xd   :  { %p4539_p6 = por %p4538_p5, %p4537_p4 }
   0xf   :  { %p4540_p7 = pnand %p4539_p6, %p4533_p3 }
  0x11   :  { %4543 = shalt.err (!%p4540_p7)
}
  0x12   :  { %20 = dma.hbm_to_vmem [thread:$0]  %s5998_s0, 896, %s18_s13, [#allocation3]  }
  0x13   :  { %s4544_s28 = scalar_lea.hbm %s5999_s1, 12544 }
  0x14   :  { %p4545_p8 = scmp.ne.s32.totalorder %s5999_s1, %s4544_s28  ;;  %p4548_p9 = scmp.lt.u32.totalorder %s4544_s28, %s5999_s1 }
  0x16   :  { %p4550_p10 = pnand %p4548_p9, %p4545_p8 }
  0x18   :  { %4553 = shalt.err (!%p4550_p10)
}
  0x19   :  { %s4554_s6 = scalar_lea.vmem %s4622_s15, 12544  ;;  %p4559_p12 = scmp.lt.s32.totalorder %s4622_s15, %s4622_s15 }
  0x1a   :  { %p4555_p11 = scmp.ne.s32.totalorder %s4622_s15, %s4554_s6  ;;  %p4560_p13 = scmp.lt.s32.totalorder %s4554_s6, %s4554_s6 }
  0x1c   :  { %p4561_p0 = por %p4560_p13, %p4559_p12 }
  0x1e   :  { %p4562_p1 = pnand %p4561_p0, %p4555_p11 }
  0x20   :  { %4565 = shalt.err (!%p4562_p1)
}
  0x21   :  { %s4596_s0 = smov 128   ;;  %s4597_s7 = smov 8  }
  0x22   :  { %32 = dma.hbm_to_vmem [thread:$0]  %s5999_s1, 12544, %s4622_s15, [#allocation6], %s4596_s0, %s4596_s0, %s4597_s7  }
  0x23   :  { %4588 = dma.done.wait [#allocation3], 896  }
  0x24   :  { %4589 = vsyncadd [#allocation3], 4294966400 }
  0x25   :  { %4590 = dma.done.wait [#allocation6], 12544  }
  0x26   :  { %4591 = vsyncadd [#allocation6], 4294954752  ;;  %v64_v0 = vld [vmem:[#allocation5 + $0x80] sm:$0xff]  ;;  %v65_v1 = vld [vmem:[#allocation5 + $0x88] sm:$0xff]  ;;  %vm153_vm0 = vcmask 130048   ;;  %vm4599_vm1 = vmmov 0  }
  0x27   :  { %v48_v2 = vld [vmem:[#allocation5] sm:$0xff]  ;;  %v206_v3 = vand.u32 4294901760, %v64_v0  ;;  %v209_v4 = vand.u32 4294901760, %v65_v1  ;;  %v49_v5 = vld [vmem:[#allocation5 + $0x8] sm:$0xff]  ;;  %v66_v7 = vld [vmem:[#allocation5 + $0x90] sm:$0xff] }
  0x28   :  { %v158_v6 = vand.u32 4294901760, %v48_v2  ;;  %v67_v8 = vld [vmem:[#allocation5 + $0x98] sm:$0xff]  ;;  %v161_v9 = vand.u32 4294901760, %v49_v5  ;;  %v212_v10 = vand.u32 4294901760, %v66_v7  ;;  %v50_v12 = vld [vmem:[#allocation5 + $0x10] sm:$0xff]  ;;  %v68_v18 = vld [vmem:[#allocation5 + $0xa0] sm:$0xff] }
  0x29   :  { %v215_v11 = vand.u32 4294901760, %v67_v8  ;;  %v51_v13 = vld [vmem:[#allocation5 + $0x18] sm:$0xff]  ;;  %v4653_v14 = vpack.c.bf16 %v209_v4, %v206_v3  ;;  %v164_v16 = vand.u32 4294901760, %v50_v12  ;;  %v69_v19 = vld [vmem:[#allocation5 + $0xa8] sm:$0xff]  ;;  %v52_v23 = vld [vmem:[#allocation5 + $0x20] sm:$0xff]  ;;  %v218_v29 = vand.u32 4294901760, %v68_v18 }
  0x2a   :  { %v4655_v15 = vsub.f32 %v48_v2, %v158_v6  ;;  %v167_v17 = vand.u32 4294901760, %v51_v13  ;;  %v4657_v20 = vpack.c.bf16 %v161_v9, %v158_v6  ;;  %v4659_v21 = vsub.f32 %v49_v5, %v161_v9  ;;  %v53_v24 = vld [vmem:[#allocation5 + $0x28] sm:$0xff]  ;;  %v70_v37 = vld [vmem:[#allocation5 + $0xb0] sm:$0xff]  ;;  %v71_v42 = vld [vmem:[#allocation5 + $0xb8] sm:$0xff] }
  0x2b   :  { %v4661_v22 = vpack.c.bf16 %v215_v11, %v212_v10  ;;  %3911 = vmatprep.subr.bf16.mxu0 %v4653_v14  ;;  %v4664_v25 = vsub.f32 %v66_v7, %v212_v10  ;;  %v4666_v26 = vsub.f32 %v67_v8, %v215_v11  ;;  %v4670_v28 = vsub.f32 %v50_v12, %v164_v16  ;;  %v54_v55 = vld [vmem:[#allocation5 + $0x30] sm:$0xff]  ;;  %v55_v56 = vld [vmem:[#allocation5 + $0x38] sm:$0xff]  ;;  %v72_v5 = vld [vmem:[#allocation5 + $0xc0] sm:$0xff] }
  0x2c   :  { %v4668_v27 = vpack.c.bf16 %v167_v17, %v164_v16  ;;  %3913 = vmatpush3.bf16.msra.mxu0 %v4657_v20  ;;  %v221_v30 = vand.u32 4294901760, %v69_v19  ;;  %v4673_v31 = vsub.f32 %v64_v0, %v206_v3  ;;  %v4675_v32 = vsub.f32 %v65_v1, %v209_v4  ;;  %v73_v6 = vld [vmem:[#allocation5 + $0xc8] sm:$0xff]  ;;  %v56_v11 = vld [vmem:[#allocation5 + $0x40] sm:$0xff] }
  0x2d   :  { %3915 = vmatprep.subr.bf16.mxu0 %v4661_v22  ;;  %v170_v33 = vand.u32 4294901760, %v52_v23  ;;  %v173_v34 = vand.u32 4294901760, %v53_v24  ;;  %v6017_v35 = vand.u32 4294901760, %v4655_v15  ;;  %v6016_v36 = vand.u32 4294901760, %v4659_v21 }
  0x2e   :  { %v4680_v38 = vsub.f32 %v51_v13, %v167_v17  ;;  %v4682_v39 = vpack.c.bf16 %v221_v30, %v218_v29  ;;  %v4684_v40 = vsub.f32 %v68_v18, %v218_v29  ;;  %v6021_v41 = vand.u32 4294901760, %v4673_v31  ;;  %v57_v29 = vld [vmem:[#allocation5 + $0x48] sm:$0xff] }
  0x2f   :  { %v4687_v43 = vsub.f32 %v69_v19, %v221_v30  ;;  %v6019_v44 = vand.u32 4294901760, %v4675_v32  ;;  %v4690_v45 = vpack.c.bf16 %v173_v34, %v170_v33  ;;  %v4692_v46 = vsub.f32 %v52_v23, %v170_v33 }
  0x30   :  { %3917 = vmatpush3.bf16.msra.mxu0 %v4668_v27  ;;  %v385_v47 = vsub.f32 %v4673_v31, %v6021_v41  ;;  %v273_v48 = vsub.f32 %v4655_v15, %v6017_v35  ;;  %v280_v49 = vsub.f32 %v4659_v21, %v6016_v36  ;;  %v224_v50 = vand.u32 4294901760, %v70_v37  ;;  %v42_v41 = vld [vmem:[#allocation2 + $0x8] sm:$0xff] }
  0x31   :  { %3919 = vmatprep.subr.bf16.mxu0 %v4682_v39  ;;  %v392_v51 = vsub.f32 %v4675_v32, %v6019_v44  ;;  %v227_v52 = vand.u32 4294901760, %v71_v42  ;;  %v6014_v53 = vand.u32 4294901760, %v4664_v25  ;;  %v6012_v54 = vand.u32 4294901760, %v4666_v26 }
  0x32   :  { %v386_v57 = vand.u32 4294901760, %v385_v47  ;;  %v4710_v58 = vsub.f32 %v53_v24, %v173_v34  ;;  %v274_v59 = vand.u32 4294901760, %v273_v48  ;;  %v281_v60 = vand.u32 4294901760, %v280_v49 }
  0x33   :  { %v393_v61 = vand.u32 4294901760, %v392_v51  ;;  %v4712_v62 = vpack.c.bf16 %v227_v52, %v224_v50  ;;  %v4714_v63 = vsub.f32 %v70_v37, %v224_v50  ;;  %v399_v0 = vsub.f32 %v4664_v25, %v6014_v53 }
  0x34   :  { %3921 = vmatpush3.bf16.msra.mxu0 %v4690_v45  ;;  %v3944_v1 = vpack.c.bf16 %v281_v60, %v274_v59  ;;  %v406_v2 = vsub.f32 %v4666_v26, %v6012_v54  ;;  %v176_v3 = vand.u32 4294901760, %v54_v55  ;;  %v179_v4 = vand.u32 4294901760, %v55_v56  ;;  %v75_v59 = vld [vmem:[#allocation5 + $0xd8] sm:$0xff] }
  0x35   :  { %v3942_v7 = vpack.c.bf16 %v393_v61, %v386_v57  ;;  %3923 = vmatprep.subr.bf16.mxu0 %v4712_v62  ;;  %v400_v8 = vand.u32 4294901760, %v399_v0  ;;  %v6011_v9 = vand.u32 4294901760, %v4670_v28  ;;  %v6009_v10 = vand.u32 4294901760, %v4680_v38  ;;  %v74_v57 = vld [vmem:[#allocation5 + $0xd0] sm:$0xff]  ;;  %v79_v54 = vld [vmem:[#allocation5 + $0xf8] sm:$0xff] }
  0x36   :  { %v4726_v12 = vsub.f32 %v71_v42, %v227_v52  ;;  %v407_v13 = vand.u32 4294901760, %v406_v2  ;;  %v4728_v16 = vpack.c.bf16 %v179_v4, %v176_v3  ;;  %v4730_v17 = vsub.f32 %v54_v55, %v176_v3 }
  0x37   :  { %3943 = vmatprep.subr.bf16.mxu1 %v3942_v7  ;;  %v287_v18 = vsub.f32 %v4670_v28, %v6011_v9  ;;  %v294_v19 = vsub.f32 %v4680_v38, %v6009_v10  ;;  %v230_v23 = vand.u32 4294901760, %v72_v5  ;;  %v233_v24 = vand.u32 4294901760, %v73_v6  ;;  %v78_v9 = vld [vmem:[#allocation5 + $0xf0] sm:$0xff] }
  0x38   :  { %3945 = vmatpush3.bf16.msra.mxu1 %v3944_v1  ;;  %v3946_v30 = vpack.c.bf16 %v407_v13, %v400_v8  ;;  %3925 = vmatpush3.bf16.msra.mxu0 %v4728_v16  ;;  %v6007_v33 = vand.u32 4294901760, %v4684_v40  ;;  %v6006_v34 = vand.u32 4294901760, %v4687_v43  ;;  %v182_v37 = vand.u32 4294901760, %v56_v11  ;;  %v58_v1 = vld [vmem:[#allocation5 + $0x50] sm:$0xff] }
  0x39   :  { %v4741_v42 = vsub.f32 %v55_v56, %v179_v4  ;;  %v288_v47 = vand.u32 4294901760, %v287_v18  ;;  %v295_v48 = vand.u32 4294901760, %v294_v19  ;;  %v4743_v49 = vpack.c.bf16 %v233_v24, %v230_v23  ;;  %v59_v18 = vld [vmem:[#allocation5 + $0x58] sm:$0xff] }
  0x3a   :  { %3947 = vmatprep.subr.bf16.mxu1 %v3946_v30  ;;  %v4745_v50 = vsub.f32 %v72_v5, %v230_v23  ;;  %v413_v51 = vsub.f32 %v4684_v40, %v6007_v33  ;;  %v420_v52 = vsub.f32 %v4687_v43, %v6006_v34  ;;  %v185_v55 = vand.u32 4294901760, %v57_v29 }
  0x3b   :  { %v3948_v56 = vpack.c.bf16 %v295_v48, %v288_v47  ;;  %3927 = vmatprep.subr.bf16.mxu0 %v4743_v49  ;;  %v4754_v60 = vsub.f32 %v73_v6, %v233_v24  ;;  %v6004_v61 = vand.u32 4294901760, %v4692_v46  ;;  %v6002_v0 = vand.u32 4294901760, %v4710_v58 }
  0x3c   :  { %v414_v2 = vand.u32 4294901760, %v413_v51  ;;  %v421_v3 = vand.u32 4294901760, %v420_v52  ;;  %v4758_v4 = vpack.c.bf16 %v185_v55, %v182_v37  ;;  %v4760_v5 = vsub.f32 %v56_v11, %v182_v37 }
  0x3d   :  { %3949 = vmatpush3.bf16.msra.mxu1 %v3948_v56  ;;  %v301_v7 = vsub.f32 %v4692_v46, %v6004_v61  ;;  %v308_v6 = vsub.f32 %v4710_v58, %v6002_v0  ;;  %v236_v8 = vand.u32 4294901760, %v74_v57  ;;  %v239_v13 = vand.u32 4294901760, %v75_v59  ;;  %v77_v0 = vld [vmem:[#allocation5 + $0xe8] sm:$0xff] }
  0x3e   :  { %v3950_v19 = vpack.c.bf16 %v421_v3, %v414_v2  ;;  %3929 = vmatpush3.bf16.msra.mxu0 %v4758_v4  ;;  %v6003_v23 = vand.u32 4294901760, %v4714_v63  ;;  %v6005_v11 = vand.u32 4294901760, %v4726_v12  ;;  %v188_v24 = vand.u32 4294901760, %v58_v1  ;;  %v76_v3 = vld [vmem:[#allocation5 + $0xe0] sm:$0xff] }
  0x3f   :  { %v4771_v30 = vsub.f32 %v57_v29, %v185_v55  ;;  %v302_v37 = vand.u32 4294901760, %v301_v7  ;;  %v309_v47 = vand.u32 4294901760, %v308_v6  ;;  %v4773_v48 = vpack.c.bf16 %v239_v13, %v236_v8  ;;  %v60_v6 = vld [vmem:[#allocation5 + $0x60] sm:$0xff] }
  0x40   :  { %3951 = vmatprep.subr.bf16.mxu1 %v3950_v19  ;;  %v4775_v51 = vsub.f32 %v74_v57, %v236_v8  ;;  %v427_v52 = vsub.f32 %v4714_v63, %v6003_v23  ;;  %v434_v56 = vsub.f32 %v4726_v12, %v6005_v11  ;;  %v191_v2 = vand.u32 4294901760, %v59_v18  ;;  %v61_v11 = vld [vmem:[#allocation5 + $0x68] sm:$0xff] }
  0x41   :  { %v3952_v29 = vpack.c.bf16 %v309_v47, %v302_v37  ;;  %3931 = vmatprep.subr.bf16.mxu0 %v4773_v48  ;;  %v4784_v55 = vsub.f32 %v75_v59, %v239_v13  ;;  %v6008_v7 = vand.u32 4294901760, %v4730_v17  ;;  %v6010_v57 = vand.u32 4294901760, %v4741_v42 }
  0x42   :  { %v428_v8 = vand.u32 4294901760, %v427_v52  ;;  %v435_v19 = vand.u32 4294901760, %v434_v56  ;;  %v4788_v23 = vpack.c.bf16 %v191_v2, %v188_v24  ;;  %v4790_v61 = vsub.f32 %v58_v1, %v188_v24 }
  0x43   :  { %3953 = vmatpush3.bf16.msra.mxu1 %v3952_v29  ;;  %v315_v37 = vsub.f32 %v4730_v17, %v6008_v7  ;;  %v322_v59 = vsub.f32 %v4741_v42, %v6010_v57  ;;  %v242_v13 = vand.u32 4294901760, %v76_v3  ;;  %v245_v47 = vand.u32 4294901760, %v77_v0 }
  0x44   :  { %6138 = vst [vmem:[#allocation11_spill] sm:$0xff] %v4788_v23  ;;  %v3954_v34 = vpack.c.bf16 %v435_v19, %v428_v8  ;;  %3933 = vmatpush3.bf16.msra.mxu0 %v4788_v23  ;;  %v6013_v52 = vand.u32 4294901760, %v4745_v50  ;;  %v6015_v1 = vand.u32 4294901760, %v4754_v60  ;;  %v194_v24 = vand.u32 4294901760, %v60_v6 }
  0x45   :  { %v4801_v56 = vsub.f32 %v59_v18, %v191_v2  ;;  %v316_v29 = vand.u32 4294901760, %v315_v37  ;;  %v323_v33 = vand.u32 4294901760, %v322_v59  ;;  %v4803_v7 = vpack.c.bf16 %v245_v47, %v242_v13  ;;  %v62_v37 = vld [vmem:[#allocation5 + $0x70] sm:$0xff] }
  0x46   :  { %3955 = vmatprep.subr.bf16.mxu1 %v3954_v34  ;;  %v4805_v10 = vsub.f32 %v76_v3, %v242_v13  ;;  %v441_v8 = vsub.f32 %v4745_v50, %v6013_v52  ;;  %v448_v19 = vsub.f32 %v4754_v60, %v6015_v1  ;;  %v197_v57 = vand.u32 4294901760, %v61_v11  ;;  %v63_v1 = vld [vmem:[#allocation5 + $0x78] sm:$0xff] }
  0x47   :  { %6139 = vst [vmem:[#allocation12_spill] sm:$0xff] %v4803_v7  ;;  %v3956_v18 = vpack.c.bf16 %v323_v33, %v316_v29  ;;  %3935 = vmatprep.subr.bf16.mxu0 %v4803_v7  ;;  %v4814_v2 = vsub.f32 %v77_v0, %v245_v47  ;;  %v6018_v34 = vand.u32 4294901760, %v4760_v5  ;;  %v6020_v3 = vand.u32 4294901760, %v4771_v30 }
  0x48   :  { %v442_v59 = vand.u32 4294901760, %v441_v8  ;;  %v449_v13 = vand.u32 4294901760, %v448_v19  ;;  %v4818_v52 = vpack.c.bf16 %v197_v57, %v194_v24  ;;  %v4820_v53 = vsub.f32 %v60_v6, %v194_v24 }
  0x49   :  { %3957 = vmatpush3.bf16.msra.mxu1 %v3956_v18  ;;  %v329_v33 = vsub.f32 %v4760_v5, %v6018_v34  ;;  %v336_v0 = vsub.f32 %v4771_v30, %v6020_v3  ;;  %v248_v47 = vand.u32 4294901760, %v78_v9  ;;  %v251_v29 = vand.u32 4294901760, %v79_v54 }
  0x4a   :  { %6140 = vst [vmem:[#allocation13_spill] sm:$0xff] %v4818_v52  ;;  %v3958_v36 = vpack.c.bf16 %v449_v13, %v442_v59  ;;  %3937 = vmatpush3.bf16.msra.mxu0 %v4818_v52  ;;  %v6024_v8 = vand.u32 4294901760, %v4775_v51  ;;  %v6025_v6 = vand.u32 4294901760, %v4784_v55  ;;  %v200_v24 = vand.u32 4294901760, %v62_v37 }
  0x4b   :  { %v4831_v19 = vsub.f32 %v61_v11, %v197_v57  ;;  %v330_v18 = vand.u32 4294901760, %v329_v33  ;;  %v337_v35 = vand.u32 4294901760, %v336_v0  ;;  %v4833_v34 = vpack.c.bf16 %v251_v29, %v248_v47 }
  0x4c   :  { %3959 = vmatprep.subr.bf16.mxu1 %v3958_v36  ;;  %v4835_v44 = vsub.f32 %v78_v9, %v248_v47  ;;  %v455_v59 = vsub.f32 %v4775_v51, %v6024_v8  ;;  %v462_v13 = vsub.f32 %v4784_v55, %v6025_v6  ;;  %v203_v3 = vand.u32 4294901760, %v63_v1  ;;  %v41_v9 = vld [vmem:[#allocation2] sm:$0xff] }
  0x4d   :  { %6141 = vst [vmem:[#allocation14_spill] sm:$0xff] %v4833_v34  ;;  %v3960_v52 = vpack.c.bf16 %v337_v35, %v330_v18  ;;  %3939 = vmatprep.subr.bf16.mxu0 %v4833_v34  ;;  %v4844_v11 = vsub.f32 %v79_v54, %v251_v29  ;;  %v6026_v57 = vand.u32 4294901760, %v4790_v61  ;;  %v6027_v36 = vand.u32 4294901760, %v4801_v56 }
  0x4e   :  { %v456_v33 = vand.u32 4294901760, %v455_v59  ;;  %v463_v0 = vand.u32 4294901760, %v462_v13  ;;  %v4848_v47 = vpack.c.bf16 %v203_v3, %v200_v24  ;;  %v4850_v8 = vsub.f32 %v62_v37, %v200_v24 }
  0x4f   :  { %3961 = vmatpush3.bf16.msra.mxu1 %v3960_v52  ;;  %v343_v35 = vsub.f32 %v4790_v61, %v6026_v57  ;;  %v350_v54 = vsub.f32 %v4801_v56, %v6027_v36  ;;  %v4858_v29 = vand.u32 4294901760, %v42_v41  ;;  %v6030_v18 = vand.u32 4294901760, %v4805_v10 }
  0x50   :  { %6142 = vst [vmem:[#allocation15_spill] sm:$0xff] %v4848_v47  ;;  %v3962_v6 = vpack.c.bf16 %v463_v0, %v456_v33  ;;  %3941 = vmatpush3.bf16.msra.mxu0 %v4848_v47  ;;  %v6036_v59 = vand.u32 4294901760, %v4814_v2  ;;  %v3974_v52 = vpack.c.bf16 %v4675_v32, %v4673_v31  ;;  %v4865_v37 = vand.u32 4294901760, %v41_v9 }
  0x51   :  { %6143 = vst [vmem:[#allocation16_spill] sm:$0xff] %v4858_v29  ;;  %v344_v24 = vand.u32 4294901760, %v343_v35  ;;  %v351_v13 = vand.u32 4294901760, %v350_v54  ;;  %v4868_v57 = vsub.f32 %v42_v41, %v4858_v29  ;;  %v469_v36 = vsub.f32 %v4805_v10, %v6030_v18  ;;  %494 = vmatprep.mubr.f32.mxu1 %v4858_v29 }
  0x52   :  { %3963 = vmatprep.subr.bf16.mxu1 %v3962_v6  ;;  %v476_v33 = vsub.f32 %v4814_v2, %v6036_v59  ;;  %3975 = vmatprep.subr.bf16.mxu0 %v3974_v52  ;;  %v4878_v0 = vsub.f32 %v41_v9, %v4865_v37  ;;  %v6035_v35 = vand.u32 4294901760, %v4820_v53  ;;  %v6037_v41 = vand.u32 4294901760, %v4831_v19 }
  0x53   :  { %v4882_v54 = vsub.f32 %v63_v1, %v203_v3  ;;  %v3964_v47 = vpack.c.bf16 %v351_v13, %v344_v24  ;;  %v6038_v18 = vand.u32 4294901760, %v4868_v57  ;;  %v470_v34 = vand.u32 4294901760, %v469_v36 }
  0x54   :  { %v477_v29 = vand.u32 4294901760, %v476_v33  ;;  %v261_v6 = vand.u32 4294901760, %v4878_v0  ;;  %v357_v52 = vsub.f32 %v4820_v53, %v6035_v35  ;;  %v364_v9 = vsub.f32 %v4831_v19, %v6037_v41 }
  0x55   :  { %3965 = vmatpush3.bf16.msra.mxu1 %v3964_v47  ;;  %v256_v1 = vsub.f32 %v4868_v57, %v6038_v18  ;;  %v3976_v3 = vpack.c.bf16 %v4659_v21, %v4655_v15  ;;  %v6043_v36 = vand.u32 4294901760, %v4835_v44  ;;  %v6046_v24 = vand.u32 4294901760, %v4844_v11 }
  0x56   :  { %v3966_v13 = vpack.c.bf16 %v477_v29, %v470_v34  ;;  %v262_v33 = vsub.f32 %v4878_v0, %v261_v6  ;;  %v358_v35 = vand.u32 4294901760, %v357_v52  ;;  %v365_v59 = vand.u32 4294901760, %v364_v9 }
  0x57   :  { %v257_v41 = vand.u32 4294901760, %v256_v1  ;;  %v483_v47 = vsub.f32 %v4835_v44, %v6043_v36  ;;  %v490_v18 = vsub.f32 %v4844_v11, %v6046_v24  ;;  %v6045_v7 = vand.u32 4294901760, %v4850_v8 }
  0x58   :  { %3967 = vmatprep.subr.bf16.mxu1 %v3966_v13  ;;  %v263_v23 = vand.u32 4294901760, %v262_v33  ;;  %v3968_v34 = vpack.c.bf16 %v365_v59, %v358_v35  ;;  %v3978_v29 = vpack.c.bf16 %v4666_v26, %v4664_v25  ;;  %v6044_v52 = vand.u32 4294901760, %v4882_v54 }
  0x59   :  { %258 = vmatprep.mubr.f32.mxu0 %v257_v41  ;;  %v484_v9 = vand.u32 4294901760, %v483_v47  ;;  %v491_v1 = vand.u32 4294901760, %v490_v18  ;;  %v371_v36 = vsub.f32 %v4850_v8, %v6045_v7  ;;  %v3980_v33 = vpack.c.bf16 %v4680_v38, %v4670_v28 }
  0x5a   :  { %264 = vmatmul.mubr.f32.vlgmr.msra.gmra.mrb[0].mxu0 %v263_v23  ;;  %3969 = vmatpush3.bf16.msra.mxu1 %v3968_v34  ;;  %v378_v13 = vsub.f32 %v4882_v54, %v6044_v52  ;;  %v3982_v41 = vpack.c.bf16 %v4687_v43, %v4684_v40  ;;  %v3984_v23 = vpack.c.bf16 %v4710_v58, %v4692_v46  ;;  %v6145_v34 = vand.u32 4294901760, %v4675_v32 }
  0x5b   :  { %3977 = vmatpush3.bf16.msra.mxu0 %v3976_v3  ;;  %v3970_v59 = vpack.c.bf16 %v491_v1, %v484_v9  ;;  %v372_v35 = vand.u32 4294901760, %v371_v36  ;;  %631 = vmatprep.mubr.f32.mxu0 %v4868_v57  ;;  %v3986_v47 = vpack.c.bf16 %v4726_v12, %v4714_v63  ;;  %v6144_v36 = vand.u32 4294901760, %v4673_v31 }
  0x5c   :  { %3979 = vmatprep.subr.bf16.mxu0 %v3978_v29  ;;  %v379_v18 = vand.u32 4294901760, %v378_v13  ;;  %v6146_v1 = vand.u32 4294901760, %v4655_v15  ;;  %v6147_v29 = vand.u32 4294901760, %v4659_v21  ;;  %v6148_v52 = vand.u32 4294901760, %v4664_v25 }
  0x5d   :  { %3971 = vmatprep.subr.bf16.mxu1 %v3970_v59  ;;  %v4038_v9 = vpack.c.bf16 %v6145_v34, %v6144_v36  ;;  %v6149_v59 = vand.u32 4294901760, %v4666_v26  ;;  %v6150_v24 = vand.u32 4294901760, %v4670_v28  ;;  %v6152_v31 = vand.u32 4294901760, %v4684_v40 }
  0x5e   :  { %v3972_v3 = vpack.c.bf16 %v379_v18, %v372_v35  ;;  %v4040_v13 = vpack.c.bf16 %v6147_v29, %v6146_v1  ;;  %v6151_v35 = vand.u32 4294901760, %v4680_v38  ;;  %v6153_v32 = vand.u32 4294901760, %v4687_v43  ;;  %v6167_v29 = vld [vmem:[#allocation16_spill] sm:$0xff] }
  0x5f   :  { %v4042_v7 = vpack.c.bf16 %v6149_v59, %v6148_v52  ;;  %3981 = vmatpush3.bf16.msra.mxu0 %v3980_v33  ;;  %v6154_v15 = vand.u32 4294901760, %v4692_v46  ;;  %v6155_v21 = vand.u32 4294901760, %v4710_v58  ;;  %v6156_v25 = vand.u32 4294901760, %v4714_v63  ;;  %v97_v59 = vld [vmem:[#allocation5 + $0x188] sm:$0xff] }
  0x60   :  { %v4044_v18 = vpack.c.bf16 %v6151_v35, %v6150_v24  ;;  %v4046_v36 = vpack.c.bf16 %v6153_v32, %v6152_v31  ;;  %v6157_v26 = vand.u32 4294901760, %v4726_v12  ;;  %3973 = vmatpush3.bf16.msra.mxu1 %v3972_v3  ;;  %3983 = vmatprep.subr.bf16.mxu0 %v3982_v41  ;;  %v6158_v28 = vand.u32 4294901760, %v4730_v17  ;;  %v80_v35 = vld [vmem:[#allocation5 + $0x100] sm:$0xff]  ;;  %v81_v31 = vld [vmem:[#allocation5 + $0x108] sm:$0xff] }
  0x61   :  { %v4951_v34 = vpack.c.bf16 %v6155_v21, %v6154_v15  ;;  %v6159_v38 = vand.u32 4294901760, %v4741_v42  ;;  %v6160_v43 = vand.u32 4294901760, %v4745_v50  ;;  %v6161_v46 = vand.u32 4294901760, %v4754_v60  ;;  %4007 = vmatprep.subr.bf16.mxu1 %v4653_v14  ;;  %v6168_v32 = vld [vmem:[#allocation13_spill] sm:$0xff]  ;;  %v6169_v15 = vld [vmem:[#allocation14_spill] sm:$0xff] }
  0x62   :  { %v4957_v52 = vpack.c.bf16 %v6157_v26, %v6156_v25  ;;  %v6162_v63 = vand.u32 4294901760, %v4760_v5  ;;  %v6163_v12 = vand.u32 4294901760, %v4771_v30  ;;  %v3988_v33 = vpack.c.bf16 %v4741_v42, %v4730_v17 }
  0x63   :  { %v4963_v40 = vpack.c.bf16 %v6159_v38, %v6158_v28  ;;  %v4969_v58 = vpack.c.bf16 %v6161_v46, %v6160_v43  ;;  %496 = vmatmul.mubr.f32.vlgmr.msra.gmra.mrb[0].mxu1 %v4865_v37  ;;  %3985 = vmatpush3.bf16.msra.mxu0 %v3984_v23  ;;  %v3990_v41 = vpack.c.bf16 %v4754_v60, %v4745_v50  ;;  %v6164_v3 = vand.u32 4294901760, %v4868_v57  ;;  %v6165_v57 = vld [vmem:[#allocation11_spill] sm:$0xff]  ;;  %v6166_v23 = vld [vmem:[#allocation12_spill] sm:$0xff]  ;;  %v98_v38 = vld [vmem:[#allocation5 + $0x190] sm:$0xff] }
  0x64   :  { %v4975_v24 = vpack.c.bf16 %v6163_v12, %v6162_v63  ;;  %4009 = vmatpush3.bf16.msra.mxu1 %v4657_v20  ;;  %3987 = vmatprep.subr.bf16.mxu0 %v3986_v47  ;;  %v3992_v1 = vpack.c.bf16 %v4771_v30, %v4760_v5  ;;  %v3994_v17 = vpack.c.bf16 %v4784_v55, %v4775_v51  ;;  %v96_v47 = vld [vmem:[#allocation5 + $0x180] sm:$0xff]  ;;  %v1071_v25 = vand.u32 4294901760, %v97_v59  ;;  %v6170_v28 = vld [vmem:[#allocation15_spill] sm:$0xff]  ;;  %v82_v46 = vld [vmem:[#allocation5 + $0x110] sm:$0xff] }
  0x65   :  { %4011 = vmatprep.subr.bf16.mxu1 %v4661_v22  ;;  %738 = vmatprep.mubr.f32.mxu1 %v6164_v3  ;;  %v3996_v42 = vpack.c.bf16 %v4801_v56, %v4790_v61  ;;  %v3998_v50 = vpack.c.bf16 %v4814_v2, %v4805_v10  ;;  %v4000_v60 = vpack.c.bf16 %v4831_v19, %v4820_v53  ;;  %v1068_v21 = vand.u32 4294901760, %v96_v47  ;;  %v83_v63 = vld [vmem:[#allocation5 + $0x118] sm:$0xff] }
  0x66   :  { %v4002_v5 = vpack.c.bf16 %v4844_v11, %v4835_v44  ;;  %v4004_v30 = vpack.c.bf16 %v4882_v54, %v4850_v8  ;;  %v1020_v26 = vand.u32 4294901760, %v80_v35  ;;  %v5019_v12 = vsub.f32 %v97_v59, %v1071_v25 }
  0x67   :  { %3989 = vmatpush3.bf16.msra.mxu0 %v3988_v33  ;;  %v5017_v43 = vsub.f32 %v96_v47, %v1068_v21 }
  0x68   :  { %4013 = vmatpush3.bf16.msra.mxu1 %v4668_v27  ;;  %3991 = vmatprep.subr.bf16.mxu0 %v3990_v41  ;;  %v1074_v41 = vand.u32 4294901760, %v98_v38  ;;  %v6056_v59 = vand.u32 4294901760, %v5019_v12 }
  0x69   :  { %4015 = vmatprep.subr.bf16.mxu1 %v4682_v39 }
  0x6b   :  { %3993 = vmatpush3.bf16.msra.mxu0 %v3992_v1  ;;  %v6173_v1 = vand.u32 4294901760, %v4790_v61 }
  0x6c   :  { %4017 = vmatpush3.bf16.msra.mxu1 %v4690_v45  ;;  %3995 = vmatprep.subr.bf16.mxu0 %v3994_v17  ;;  %v6174_v17 = vand.u32 4294901760, %v4801_v56  ;;  %v6179_v56 = vand.u32 4294901760, %v4835_v44  ;;  %v84_v44 = vld [vmem:[#allocation5 + $0x120] sm:$0xff] }
  0x6d   :  { %4019 = vmatprep.subr.bf16.mxu1 %v4712_v62 }
  0x6f   :  { %3997 = vmatpush3.bf16.msra.mxu0 %v3996_v42  ;;  %v4060_v42 = vpack.c.bf16 %v6174_v17, %v6173_v1  ;;  %v102_v17 = vld [vmem:[#allocation5 + $0x1b0] sm:$0xff] }
  0x70   :  { %4021 = vmatpush3.bf16.msra.mxu1 %v4728_v16  ;;  %3999 = vmatprep.subr.bf16.mxu0 %v3998_v50  ;;  %v100_v50 = vld [vmem:[#allocation5 + $0x1a0] sm:$0xff] }
  0x71   :  { %4023 = vmatprep.subr.bf16.mxu1 %v4743_v49 }
  0x73   :  { %4001 = vmatpush3.bf16.msra.mxu0 %v4000_v60  ;;  %v101_v60 = vld [vmem:[#allocation5 + $0x1a8] sm:$0xff] }
  0x74   :  { %4025 = vmatpush3.bf16.msra.mxu1 %v4758_v4  ;;  %4003 = vmatprep.subr.bf16.mxu0 %v4002_v5 }
  0x75   :  { %4027 = vmatprep.subr.bf16.mxu1 %v4773_v48 }
  0x77   :  { %4005 = vmatpush3.bf16.msra.mxu0 %v4004_v30  ;;  %v6182_v30 = vand.u32 4294901760, %v4882_v54 }
  0x78   :  { %4029 = vmatpush3.bf16.msra.mxu1 %v6165_v57  ;;  %4039 = vmatprep.subr.bf16.mxu0 %v4038_v9  ;;  %v1023_v9 = vand.u32 4294901760, %v81_v31 }
  0x79   :  { %4031 = vmatprep.subr.bf16.mxu1 %v6166_v23 }
  0x7a   :  { %634 = vmatmul.mubr.f32.vlgmr.msra.gmra.mrb[2].mxu0 %v4878_v0  ;;  %v5023_v33 = vsub.f32 %v81_v31, %v1023_v9  ;;  %v6175_v0 = vand.u32 4294901760, %v4805_v10  ;;  %v6180_v10 = vand.u32 4294901760, %v4844_v11 }
  0x7b   :  { %4041 = vmatpush3.bf16.msra.mxu0 %v4040_v13  ;;  %908 = vmatprep.mubr.f32.mxu0 %v6167_v29  ;;  %v99_v13 = vld [vmem:[#allocation5 + $0x198] sm:$0xff] }
  0x7c   :  { %4033 = vmatpush3.bf16.msra.mxu1 %v6168_v32  ;;  %4043 = vmatprep.subr.bf16.mxu0 %v4042_v7  ;;  %v5021_v7 = vsub.f32 %v80_v35, %v1020_v26  ;;  %v1077_v3 = vand.u32 4294901760, %v99_v13  ;;  %v5055_v5 = vpack.c.bf16 %v6180_v10, %v6179_v56  ;;  %v85_v35 = vld [vmem:[#allocation5 + $0x128] sm:$0xff]  ;;  %v6047_v31 = vand.u32 4294901760, %v5023_v33 }
  0x7d   :  { %4035 = vmatprep.subr.bf16.mxu1 %v6169_v15 }
  0x7e   :  { %v6053_v11 = vand.u32 4294901760, %v5021_v7  ;;  %v5073_v54 = vpack.c.bf16 %v1077_v3, %v1074_v41 }
  0x7f   :  { %4045 = vmatpush3.bf16.msra.mxu0 %v4044_v18  ;;  %v6171_v18 = vand.u32 4294901760, %v4775_v51  ;;  %v1026_v51 = vand.u32 4294901760, %v82_v46 }
  0x80   :  { %4037 = vmatpush3.bf16.msra.mxu1 %v6170_v28  ;;  %4047 = vmatprep.subr.bf16.mxu0 %v4046_v36  ;;  %v6172_v36 = vand.u32 4294901760, %v4784_v55  ;;  %v1029_v55 = vand.u32 4294901760, %v83_v63  ;;  %6184 = vst [vmem:[#allocation12_spill] sm:$0xff] %v5073_v54 }
  0x81   :  { %4071 = vmatprep.subr.bf16.mxu1 %v4653_v14 }
  0x82   :  { %v4058_v14 = vpack.c.bf16 %v6172_v36, %v6171_v18  ;;  %v1083_v18 = vand.u32 4294901760, %v101_v60  ;;  %v5081_v36 = vpack.c.bf16 %v1029_v55, %v1026_v51 }
  0x83   :  { %742 = vmatmul.mubr.f32.vlgmr.msra.gmra.mrb[2].mxu1 %v261_v6  ;;  %4049 = vmatpush3.bf16.msra.mxu0 %v4951_v34  ;;  %v6176_v6 = vand.u32 4294901760, %v4814_v2  ;;  %v6181_v2 = vand.u32 4294901760, %v4850_v8  ;;  %v5071_v8 = vpack.c.bf16 %v1023_v9, %v1020_v26  ;;  %v1032_v9 = vand.u32 4294901760, %v84_v44 }
  0x84   :  { %4073 = vmatpush3.bf16.msra.mxu1 %v4657_v20  ;;  %4051 = vmatprep.subr.bf16.mxu0 %v4957_v52  ;;  %v6177_v20 = vand.u32 4294901760, %v4820_v53  ;;  %v6178_v52 = vand.u32 4294901760, %v4831_v19  ;;  %v44_v53 = vld [vmem:[#allocation2 + $0x18] sm:$0xff]  ;;  %v5065_v19 = vpack.c.bf16 %v1071_v25, %v1068_v21  ;;  %v5077_v21 = vsub.f32 %v98_v38, %v1074_v41  ;;  %6185 = vst [vmem:[#allocation16_spill] sm:$0xff] %v5081_v36 }
  0x85   :  { %v5042_v34 = vpack.c.bf16 %v6176_v6, %v6175_v0  ;;  %4075 = vmatprep.subr.bf16.mxu1 %v4661_v22  ;;  %v5061_v47 = vpack.c.bf16 %v6182_v30, %v6181_v2  ;;  %1012 = vmatprep.mubr.f32.mxu1 %v6167_v29  ;;  %v6057_v22 = vand.u32 4294901760, %v5017_v43  ;;  %6183 = vst [vmem:[#allocation11_spill] sm:$0xff] %v5071_v8  ;;  %v1080_v29 = vand.u32 4294901760, %v100_v50 }
  0x86   :  { %v5049_v61 = vpack.c.bf16 %v6178_v52, %v6177_v20  ;;  %v5079_v25 = vsub.f32 %v99_v13, %v1077_v3  ;;  %v5083_v1 = vand.u32 4294901760, %v44_v53  ;;  %v5091_v38 = vsub.f32 %v83_v63, %v1029_v55  ;;  %v86_v52 = vld [vmem:[#allocation5 + $0x130] sm:$0xff] }
  0x87   :  { %4053 = vmatpush3.bf16.msra.mxu0 %v4963_v40  ;;  %v5086_v40 = vsub.f32 %v82_v46, %v1026_v51  ;;  %v1247_v26 = vsub.f32 %v5017_v43, %v6057_v22  ;;  %v1254_v13 = vsub.f32 %v5019_v12, %v6056_v59  ;;  %v1142_v46 = vsub.f32 %v5023_v33, %v6047_v31  ;;  %v104_v31 = vld [vmem:[#allocation5 + $0x1c0] sm:$0xff]  ;;  %v91_v22 = vld [vmem:[#allocation5 + $0x158] sm:$0xff] }
  0x88   :  { %4077 = vmatpush3.bf16.msra.mxu1 %v4668_v27  ;;  %4055 = vmatprep.subr.bf16.mxu0 %v4969_v58  ;;  %6186 = vst [vmem:[#allocation13_spill] sm:$0xff] %v5083_v1  ;;  %v1035_v27 = vand.u32 4294901760, %v85_v35  ;;  %v103_v58 = vld [vmem:[#allocation5 + $0x1b8] sm:$0xff]  ;;  %v5103_v41 = vpack.c.bf16 %v1083_v18, %v1080_v29  ;;  %v5105_v3 = vsub.f32 %v100_v50, %v1080_v29  ;;  %v1086_v6 = vand.u32 4294901760, %v102_v17 }
  0x89   :  { %4079 = vmatprep.subr.bf16.mxu1 %v4682_v39  ;;  %v1135_v39 = vsub.f32 %v5021_v7, %v6053_v11  ;;  %v5107_v63 = vsub.f32 %v101_v60, %v1083_v18  ;;  %v5110_v0 = vsub.f32 %v44_v53, %v5083_v1  ;;  %v1089_v51 = vand.u32 4294901760, %v103_v58 }
  0x8a   :  { %6187 = vst [vmem:[#allocation14_spill] sm:$0xff] %v5103_v41  ;;  %v6051_v55 = vand.u32 4294901760, %v5077_v21  ;;  %v6048_v20 = vand.u32 4294901760, %v5079_v25  ;;  %v1248_v50 = vand.u32 4294901760, %v1247_v26  ;;  %v5116_v56 = vpack.c.bf16 %v1035_v27, %v1032_v9 }
  0x8b   :  { %4057 = vmatpush3.bf16.msra.mxu0 %v4975_v24  ;;  %v87_v24 = vld [vmem:[#allocation5 + $0x138] sm:$0xff]  ;;  %v5118_v60 = vsub.f32 %v84_v44, %v1032_v9  ;;  %v5120_v10 = vsub.f32 %v85_v35, %v1035_v27  ;;  %v1255_v2 = vand.u32 4294901760, %v1254_v13  ;;  %v6050_v30 = vand.u32 4294901760, %v5086_v40  ;;  %v105_v27 = vld [vmem:[#allocation5 + $0x1c8] sm:$0xff] }
  0x8c   :  { %4081 = vmatpush3.bf16.msra.mxu1 %v4690_v45  ;;  %4059 = vmatprep.subr.bf16.mxu0 %v4058_v14  ;;  %6188 = vst [vmem:[#allocation15_spill] sm:$0xff] %v5116_v56  ;;  %v1136_v45 = vand.u32 4294901760, %v1135_v39  ;;  %v1143_v14 = vand.u32 4294901760, %v1142_v46  ;;  %v1038_v53 = vand.u32 4294901760, %v86_v52  ;;  %v1041_v29 = vand.u32 4294901760, %v87_v24 }
  0x8d   :  { %4083 = vmatprep.subr.bf16.mxu1 %v4712_v62  ;;  %v6049_v18 = vand.u32 4294901760, %v5091_v38  ;;  %v6060_v62 = vand.u32 4294901760, %v5110_v0  ;;  %v5127_v44 = vpack.c.bf16 %v1089_v51, %v1086_v6  ;;  %v1261_v35 = vsub.f32 %v5077_v21, %v6051_v55 }
  0x8e   :  { %v5136_v26 = vsub.f32 %v102_v17, %v1086_v6  ;;  %v5138_v9 = vsub.f32 %v103_v58, %v1089_v51  ;;  %v5142_v13 = vpack.c.bf16 %v1255_v2, %v1248_v50  ;;  %v5144_v39 = vpack.c.bf16 %v1143_v14, %v1136_v45 }
  0x8f   :  { %4061 = vmatpush3.bf16.msra.mxu0 %v4060_v42  ;;  %6189 = vst [vmem:[#allocation17_spill] sm:$0xff] %v5127_v44  ;;  %v1268_v42 = vsub.f32 %v5079_v25, %v6048_v20  ;;  %v1149_v46 = vsub.f32 %v5086_v40, %v6050_v30  ;;  %v1092_v20 = vand.u32 4294901760, %v104_v31  ;;  %v1156_v17 = vsub.f32 %v5091_v38, %v6049_v18 }
  0x90   :  { %4085 = vmatpush3.bf16.msra.mxu1 %v4728_v16  ;;  %4063 = vmatprep.subr.bf16.mxu0 %v5042_v34  ;;  %v6052_v16 = vand.u32 4294901760, %v5105_v3  ;;  %v6055_v34 = vand.u32 4294901760, %v5107_v63  ;;  %v6054_v58 = vand.u32 4294901760, %v5118_v60  ;;  %v1118_v6 = vsub.f32 %v5110_v0, %v6060_v62 }
  0x91   :  { %4087 = vmatprep.subr.bf16.mxu1 %v4743_v49  ;;  %v5150_v49 = vpack.c.bf16 %v1041_v29, %v1038_v53  ;;  %v1262_v51 = vand.u32 4294901760, %v1261_v35  ;;  %v1269_v50 = vand.u32 4294901760, %v1268_v42  ;;  %v1095_v2 = vand.u32 4294901760, %v105_v27  ;;  %v89_v42 = vld [vmem:[#allocation5 + $0x148] sm:$0xff] }
  0x92   :  { %v6059_v45 = vand.u32 4294901760, %v5120_v10  ;;  %v5163_v14 = vsub.f32 %v86_v52, %v1038_v53  ;;  %v5165_v18 = vsub.f32 %v87_v24, %v1041_v29  ;;  %v1275_v30 = vsub.f32 %v5105_v3, %v6052_v16  ;;  %v106_v29 = vld [vmem:[#allocation5 + $0x1d0] sm:$0xff]  ;;  %v107_v16 = vld [vmem:[#allocation5 + $0x1d8] sm:$0xff] }
  0x93   :  { %4065 = vmatpush3.bf16.msra.mxu0 %v5049_v61  ;;  %6190 = vst [vmem:[#allocation18_spill] sm:$0xff] %v5150_v49  ;;  %v88_v61 = vld [vmem:[#allocation5 + $0x140] sm:$0xff]  ;;  %v5173_v35 = vsub.f32 %v104_v31, %v1092_v20  ;;  %v6058_v55 = vand.u32 4294901760, %v5136_v26  ;;  %v1157_v52 = vand.u32 4294901760, %v1156_v17  ;;  %v1163_v53 = vsub.f32 %v5118_v60, %v6054_v58 }
  0x94   :  { %4089 = vmatpush3.bf16.msra.mxu1 %v4758_v4  ;;  %4067 = vmatprep.subr.bf16.mxu0 %v5055_v5  ;;  %v1282_v4 = vsub.f32 %v5107_v63, %v6055_v34  ;;  %v1150_v5 = vand.u32 4294901760, %v1149_v46  ;;  %v1044_v24 = vand.u32 4294901760, %v88_v61  ;;  %v1119_v11 = vand.u32 4294901760, %v1118_v6  ;;  %v90_v6 = vld [vmem:[#allocation5 + $0x150] sm:$0xff] }
  0x95   :  { %4091 = vmatprep.subr.bf16.mxu1 %v4773_v48  ;;  %v6061_v48 = vand.u32 4294901760, %v5138_v9  ;;  %v5183_v31 = vpack.c.bf16 %v1269_v50, %v1262_v51  ;;  %v5185_v46 = vpack.c.bf16 %v1095_v2, %v1092_v20  ;;  %v5191_v17 = vsub.f32 %v105_v27, %v1095_v2 }
  0x96   :  { %v1276_v58 = vand.u32 4294901760, %v1275_v30  ;;  %v1283_v34 = vand.u32 4294901760, %v1282_v4  ;;  %v1047_v59 = vand.u32 4294901760, %v89_v42  ;;  %v1101_v51 = vand.u32 4294901760, %v107_v16 }
  0x97   :  { %4069 = vmatpush3.bf16.msra.mxu0 %v5061_v47  ;;  %6191 = vst [vmem:[#allocation19_spill] sm:$0xff] %v5185_v46  ;;  %v1170_v47 = vsub.f32 %v5120_v10, %v6059_v45  ;;  %v1289_v20 = vsub.f32 %v5136_v26, %v6058_v55  ;;  %v1296_v50 = vsub.f32 %v5138_v9, %v6061_v48  ;;  %v1164_v27 = vand.u32 4294901760, %v1163_v53  ;;  %v108_v48 = vld [vmem:[#allocation5 + $0x1e0] sm:$0xff]  ;;  %v109_v53 = vld [vmem:[#allocation5 + $0x1e8] sm:$0xff] }
  0x98   :  { %4093 = vmatpush3.bf16.msra.mxu1 %v6165_v57  ;;  %4103 = vmatprep.subr.bf16.mxu0 %v5065_v19  ;;  %v1098_v57 = vand.u32 4294901760, %v106_v29  ;;  %v5203_v30 = vsub.f32 %v88_v61, %v1044_v24  ;;  %v1050_v55 = vand.u32 4294901760, %v90_v6  ;;  %v1053_v45 = vand.u32 4294901760, %v91_v22 }
  0x99   :  { %4095 = vmatprep.subr.bf16.mxu1 %v6166_v23  ;;  %v5201_v23 = vpack.c.bf16 %v1157_v52, %v1150_v5  ;;  %v1171_v4 = vand.u32 4294901760, %v1170_v47  ;;  %v6066_v62 = vand.u32 4294901760, %v5165_v18  ;;  %v5210_v5 = vpack.c.bf16 %v1283_v34, %v1276_v58 }
  0x9a   :  { %910 = vmatmul.mubr.f32.vlgmr.msra.gmra.mrb[4].mxu0 %v4865_v37  ;;  %v5212_v61 = vpack.c.bf16 %v1047_v59, %v1044_v24  ;;  %v5214_v52 = vsub.f32 %v89_v42, %v1047_v59  ;;  %v1290_v2 = vand.u32 4294901760, %v1289_v20  ;;  %v1297_v47 = vand.u32 4294901760, %v1296_v50  ;;  %v5247_v50 = vld [vmem:[#allocation5 + $0x168] sm:$0xff] }
  0x9b   :  { %4105 = vmatpush3.bf16.msra.mxu0 %v5071_v8  ;;  %1120 = vmatprep.mubr.f32.mxu0 %v1119_v11  ;;  %v6068_v11 = vand.u32 4294901760, %v5173_v35  ;;  %v5220_v8 = vld [vmem:[#allocation5 + $0x160] sm:$0xff]  ;;  %v5225_v34 = vsub.f32 %v107_v16, %v1101_v51  ;;  %v6195_v59 = vand.u32 4294901760, %v5163_v14  ;;  %v1104_v42 = vand.u32 4294901760, %v108_v48 }
  0x9c   :  { %4097 = vmatpush3.bf16.msra.mxu1 %v6168_v32  ;;  %4107 = vmatprep.subr.bf16.mxu0 %v5073_v54  ;;  %v5217_v32 = vpack.c.bf16 %v1101_v51, %v1098_v57  ;;  %v6067_v54 = vand.u32 4294901760, %v5191_v17  ;;  %v5232_v24 = vpack.c.bf16 %v1171_v4, %v1164_v27  ;;  %v5234_v20 = vpack.c.bf16 %v1053_v45, %v1050_v55 }
  0x9d   :  { %4099 = vmatprep.subr.bf16.mxu1 %v6169_v15  ;;  %v5223_v15 = vsub.f32 %v106_v29, %v1098_v57  ;;  %6194 = vst [vmem:[#allocation22_spill] sm:$0xff] %v5225_v34  ;;  %v1177_v58 = vsub.f32 %v5163_v14, %v6195_v59  ;;  %v1184_v29 = vsub.f32 %v5165_v18, %v6066_v62  ;;  %v1107_v57 = vand.u32 4294901760, %v109_v53 }
  0x9e   :  { %6192 = vst [vmem:[#allocation20_spill] sm:$0xff] %v5217_v32  ;;  %v5240_v16 = vsub.f32 %v90_v6, %v1050_v55  ;;  %v5242_v51 = vsub.f32 %v91_v22, %v1053_v45  ;;  %v6069_v27 = vand.u32 4294901760, %v5220_v8  ;;  %v4146_v4 = vpack.c.bf16 %v1297_v47, %v1290_v2  ;;  %v5257_v22 = vld [vmem:[#allocation5 + $0x1f8] sm:$0xff]  ;;  %v5280_v2 = vld [vmem:[#allocation5 + $0x170] sm:$0xff] }
  0x9f   :  { %4109 = vmatpush3.bf16.msra.mxu0 %v5081_v36  ;;  %6193 = vst [vmem:[#allocation21_spill] sm:$0xff] %v5223_v15  ;;  %v1310_v59 = vsub.f32 %v5191_v17, %v6067_v54  ;;  %v1178_v45 = vand.u32 4294901760, %v1177_v58  ;;  %v5261_v6 = vsub.f32 %v108_v48, %v1104_v42  ;;  %v43_v54 = vld [vmem:[#allocation2 + $0x10] sm:$0xff]  ;;  %v5267_v55 = vpack.c.bf16 %v1107_v57, %v1104_v42 }
  0xa0   :  { %4101 = vmatpush3.bf16.msra.mxu1 %v6170_v28  ;;  %4111 = vmatprep.subr.bf16.mxu0 %v5103_v41  ;;  %v1303_v28 = vsub.f32 %v5173_v35, %v6068_v11  ;;  %v1185_v11 = vand.u32 4294901760, %v1184_v29  ;;  %v5269_v62 = vsub.f32 %v109_v53, %v1107_v57  ;;  %v5276_v58 = vsub.f32 %v5220_v8, %v6069_v27  ;;  %v5282_v42 = vld [vmem:[#allocation5 + $0x178] sm:$0xff] }
  0xa1   :  { %4135 = vmatprep.subr.bf16.mxu1 %v5142_v13  ;;  %v5255_v13 = vld [vmem:[#allocation5 + $0x1f0] sm:$0xff]  ;;  %v1311_v53 = vand.u32 4294901760, %v1310_v59  ;;  %v6196_v29 = vand.u32 4294901760, %v5203_v30  ;;  %v6197_v57 = vand.u32 4294901760, %v5214_v52  ;;  %v5291_v27 = vand.u32 4294901760, %v43_v54 }
  0xa2   :  { %v1304_v48 = vand.u32 4294901760, %v1303_v28  ;;  %v1110_v47 = vand.u32 4294901760, %v5255_v13  ;;  %v6199_v41 = vand.u32 4294901760, %v5225_v34 }
  0xa3   :  { %1014 = vmatmul.mubr.f32.vlgmr.msra.gmra.mrb[4].mxu1 %v4865_v37  ;;  %4113 = vmatpush3.bf16.msra.mxu0 %v5116_v56  ;;  %v1059_v37 = vand.u32 4294901760, %v5247_v50  ;;  %v1198_v28 = vsub.f32 %v5214_v52, %v6197_v57  ;;  %v4148_v57 = vpack.c.bf16 %v1185_v11, %v1178_v45 }
  0xa4   :  { %4137 = vmatpush3.bf16.msra.mxu1 %v5144_v39  ;;  %4115 = vmatprep.subr.bf16.mxu0 %v5127_v44  ;;  %v1113_v39 = vand.u32 4294901760, %v5257_v22  ;;  %v6198_v44 = vand.u32 4294901760, %v5223_v15  ;;  %v1324_v59 = vsub.f32 %v5225_v34, %v6199_v41  ;;  %v5311_v41 = vsub.f32 %v5255_v13, %v1110_v47 }
  0xa5   :  { %4139 = vmatprep.subr.bf16.mxu1 %v5183_v31  ;;  %1356 = vmatprep.mubr.f32.mxu1 %v5083_v1  ;;  %v1191_v31 = vsub.f32 %v5203_v30, %v6196_v29  ;;  %v5305_v36 = vsub.f32 %v5247_v50, %v1059_v37  ;;  %v6090_v29 = vand.u32 4294901760, %v5269_v62  ;;  %v4150_v11 = vpack.c.bf16 %v1311_v53, %v1304_v48 }
  0xa6   :  { %v1317_v56 = vsub.f32 %v5223_v15, %v6198_v44  ;;  %v1065_v44 = vand.u32 4294901760, %v5282_v42  ;;  %v5314_v1 = vsub.f32 %v5257_v22, %v1113_v39  ;;  %v1199_v50 = vand.u32 4294901760, %v1198_v28 }
  0xa7   :  { %4117 = vmatpush3.bf16.msra.mxu0 %v5150_v49  ;;  %v1062_v49 = vand.u32 4294901760, %v5280_v2  ;;  %v1192_v45 = vand.u32 4294901760, %v1191_v31  ;;  %v6200_v13 = vand.u32 4294901760, %v5240_v16  ;;  %v6201_v22 = vand.u32 4294901760, %v5242_v51 }
  0xa8   :  { %4141 = vmatpush3.bf16.msra.mxu1 %v5201_v23  ;;  %4119 = vmatprep.subr.bf16.mxu0 %v5185_v46  ;;  %v5319_v46 = vsub.f32 %v43_v54, %v5291_v27  ;;  %v1318_v34 = vand.u32 4294901760, %v1317_v56  ;;  %v5334_v54 = vsub.f32 %v5282_v42, %v1065_v44  ;;  %v6202_v31 = vand.u32 4294901760, %v5261_v6 }
  0xa9   :  { %4143 = vmatprep.subr.bf16.mxu1 %v5210_v5  ;;  %v1325_v5 = vand.u32 4294901760, %v1324_v59  ;;  %v1205_v15 = vsub.f32 %v5240_v16, %v6200_v13  ;;  %v1212_v23 = vsub.f32 %v5242_v51, %v6201_v22  ;;  %v5331_v48 = vsub.f32 %v5280_v2, %v1062_v49 }
  0xaa   :  { %v1331_v28 = vsub.f32 %v5261_v6, %v6202_v31  ;;  %v1344_v59 = vand.u32 4294901760, %v5311_v41  ;;  %v6203_v42 = vand.u32 4294901760, %v5220_v8  ;;  %v5350_v22 = vpack.c.bf16 %v1113_v39, %v1110_v47 }
  0xab   :  { %4121 = vmatpush3.bf16.msra.mxu0 %v5212_v61  ;;  %v4152_v53 = vpack.c.bf16 %v1199_v50, %v1192_v45  ;;  %v4154_v31 = vpack.c.bf16 %v1325_v5, %v1318_v34  ;;  %v1206_v56 = vand.u32 4294901760, %v1205_v15  ;;  %v6205_v8 = vand.u32 4294901760, %v5305_v36 }
  0xac   :  { %4145 = vmatpush3.bf16.msra.mxu1 %v5232_v24  ;;  %4123 = vmatprep.subr.bf16.mxu0 %v5217_v32  ;;  %v1338_v24 = vsub.f32 %v5269_v62, %v6090_v29  ;;  %v5348_v13 = vpack.c.bf16 %v1059_v37, %v6203_v42  ;;  %v1213_v32 = vand.u32 4294901760, %v1212_v23  ;;  %v6204_v29 = vand.u32 4294901760, %v5276_v58 }
  0xad   :  { %4147 = vmatprep.subr.bf16.mxu1 %v4146_v4  ;;  %v1123_v4 = vand.u32 4294901760, %v5319_v46  ;;  %v1226_v47 = vsub.f32 %v5305_v36, %v6205_v8  ;;  %v6091_v37 = vand.u32 4294901760, %v5331_v48  ;;  %v6092_v39 = vand.u32 4294901760, %v5334_v54 }
  0xae   :  { %v1219_v2 = vsub.f32 %v5276_v58, %v6204_v29  ;;  %v1332_v45 = vand.u32 4294901760, %v1331_v28  ;;  %v1339_v34 = vand.u32 4294901760, %v1338_v24  ;;  %v1345_v15 = vsub.f32 %v5311_v41, %v1344_v59 }
  0xaf   :  { %4125 = vmatpush3.bf16.msra.mxu0 %v5234_v20  ;;  %v1124_v29 = vsub.f32 %v5319_v46, %v1123_v4  ;;  %v5373_v50 = vpack.c.bf16 %v1065_v44, %v1062_v49  ;;  %v4156_v5 = vpack.c.bf16 %v1213_v32, %v1206_v56  ;;  %v1227_v24 = vand.u32 4294901760, %v1226_v47 }
  0xb0   :  { %4149 = vmatpush3.bf16.msra.mxu1 %v4148_v57  ;;  %4127 = vmatprep.subr.bf16.mxu0 %v5267_v55  ;;  %v6206_v57 = vand.u32 4294901760, %v5314_v1  ;;  %v1220_v28 = vand.u32 4294901760, %v1219_v2  ;;  %v1233_v42 = vsub.f32 %v5331_v48, %v6091_v37  ;;  %v1240_v8 = vsub.f32 %v5334_v54, %v6092_v39 }
  0xb1   :  { %4151 = vmatprep.subr.bf16.mxu1 %v4150_v11  ;;  %v4166_v11 = vpack.c.bf16 %v5019_v12, %v5017_v43  ;;  %v4158_v49 = vpack.c.bf16 %v1339_v34, %v1332_v45  ;;  %v1346_v44 = vand.u32 4294901760, %v1345_v15  ;;  %v1125_v56 = vand.u32 4294901760, %v1124_v29  ;;  %v6207_v29 = vld [vmem:[#allocation11_spill] sm:$0xff] }
  0xb2   :  { %v1352_v23 = vsub.f32 %v5314_v1, %v6206_v57  ;;  %v4160_v2 = vpack.c.bf16 %v1227_v24, %v1220_v28  ;;  %v4170_v47 = vpack.c.bf16 %v5079_v25, %v5077_v21  ;;  %v1234_v57 = vand.u32 4294901760, %v1233_v42  ;;  %v6210_v24 = vld [vmem:[#allocation16_spill] sm:$0xff]  ;;  %v6211_v42 = vld [vmem:[#allocation21_spill] sm:$0xff] }
  0xb3   :  { %4129 = vmatpush3.bf16.msra.mxu0 %v5348_v13  ;;  %v1241_v37 = vand.u32 4294901760, %v1240_v8  ;;  %v4174_v34 = vpack.c.bf16 %v5107_v63, %v5105_v3  ;;  %v4176_v15 = vpack.c.bf16 %v5120_v10, %v5118_v60  ;;  %v4184_v28 = vpack.c.bf16 %v5214_v52, %v5203_v30  ;;  %v6212_v8 = vld [vmem:[#allocation22_spill] sm:$0xff] }
  0xb4   :  { %4153 = vmatpush3.bf16.msra.mxu1 %v4152_v53  ;;  %4131 = vmatprep.subr.bf16.mxu0 %v5350_v22  ;;  %v1353_v32 = vand.u32 4294901760, %v1352_v23  ;;  %v4168_v53 = vpack.c.bf16 %v5023_v33, %v5021_v7  ;;  %v4178_v23 = vpack.c.bf16 %v5138_v9, %v5136_v26 }
  0xb5   :  { %4155 = vmatprep.subr.bf16.mxu1 %v4154_v31  ;;  %v4172_v31 = vpack.c.bf16 %v5091_v38, %v5086_v40  ;;  %v4164_v45 = vpack.c.bf16 %v1241_v37, %v1234_v57  ;;  %v4180_v37 = vpack.c.bf16 %v5165_v18, %v5163_v14  ;;  %v4194_v57 = vpack.c.bf16 %v5314_v1, %v5311_v41 }
  0xb6   :  { %v4162_v39 = vpack.c.bf16 %v1353_v32, %v1346_v44  ;;  %v6213_v44 = vld [vmem:[#allocation14_spill] sm:$0xff]  ;;  %v4188_v32 = vpack.c.bf16 %v5242_v51, %v5240_v16 }
  0xb7   :  { %4133 = vmatpush3.bf16.msra.mxu0 %v5373_v50 }
  0xb8   :  { %4157 = vmatpush3.bf16.msra.mxu1 %v4156_v5  ;;  %4167 = vmatprep.subr.bf16.mxu0 %v4166_v11  ;;  %v6208_v5 = vld [vmem:[#allocation12_spill] sm:$0xff]  ;;  %v6209_v11 = vand.u32 4294901760, %v5110_v0 }
  0xb9   :  { %4159 = vmatprep.subr.bf16.mxu1 %v4158_v49  ;;  %v4186_v49 = vpack.c.bf16 %v6212_v8, %v6211_v42 }
  0xba   :  { %1126 = vmatmul.mubr.f32.vlgmr.msra.gmra.mrb[6].mxu0 %v1125_v56  ;;  %v6214_v56 = vld [vmem:[#allocation15_spill] sm:$0xff] }
  0xbb   :  { %4169 = vmatpush3.bf16.msra.mxu0 %v4168_v53  ;;  %1493 = vmatprep.mubr.f32.mxu0 %v5110_v0  ;;  %v4190_v0 = vpack.c.bf16 %v5269_v62, %v5261_v6  ;;  %v6215_v53 = vld [vmem:[#allocation17_spill] sm:$0xff] }
  0xbc   :  { %4161 = vmatpush3.bf16.msra.mxu1 %v4160_v2  ;;  %4171 = vmatprep.subr.bf16.mxu0 %v4170_v47  ;;  %v4192_v2 = vpack.c.bf16 %v5305_v36, %v5276_v58  ;;  %v6216_v47 = vld [vmem:[#allocation18_spill] sm:$0xff] }
  0xbd   :  { %4163 = vmatprep.subr.bf16.mxu1 %v4162_v39  ;;  %v4182_v39 = vpack.c.bf16 %v5191_v17, %v5173_v35 }
  0xbf   :  { %4173 = vmatpush3.bf16.msra.mxu0 %v4172_v31  ;;  %v6217_v31 = vld [vmem:[#allocation19_spill] sm:$0xff] }
  0xc0   :  { %4165 = vmatpush3.bf16.msra.mxu1 %v4164_v45  ;;  %4175 = vmatprep.subr.bf16.mxu0 %v4174_v34  ;;  %v4196_v45 = vpack.c.bf16 %v5334_v54, %v5331_v48  ;;  %v6218_v34 = vand.u32 4294901760, %v5017_v43  ;;  %v128_v43 = vld [vmem:[#allocation5 + $0x280] sm:$0xff] }
  0xc1   :  { %4199 = vmatprep.subr.bf16.mxu1 %v5065_v19 }
  0xc3   :  { %1358 = vmatmul.mubr.f32.vlgmr.msra.gmra.mrb[6].mxu1 %v5291_v27  ;;  %4177 = vmatpush3.bf16.msra.mxu0 %v4176_v15  ;;  %v6219_v15 = vand.u32 4294901760, %v5019_v12  ;;  %v6225_v12 = vand.u32 4294901760, %v5086_v40  ;;  %v6230_v40 = vand.u32 4294901760, %v5118_v60  ;;  %v6234_v60 = vand.u32 4294901760, %v5163_v14 }
  0xc4   :  { %4201 = vmatpush3.bf16.msra.mxu1 %v6207_v29  ;;  %4179 = vmatprep.subr.bf16.mxu0 %v4178_v23  ;;  %v6241_v14 = vand.u32 4294901760, %v6212_v8 }
  0xc5   :  { %4203 = vmatprep.subr.bf16.mxu1 %v6208_v5  ;;  %1600 = vmatprep.mubr.f32.mxu1 %v6209_v11  ;;  %v4230_v23 = vpack.c.bf16 %v6219_v15, %v6218_v34  ;;  %v6222_v11 = vand.u32 4294901760, %v5023_v33  ;;  %v1930_v34 = vand.u32 4294901760, %v128_v43  ;;  %v112_v15 = vld [vmem:[#allocation5 + $0x200] sm:$0xff] }
  0xc7   :  { %4181 = vmatpush3.bf16.msra.mxu0 %v4180_v37  ;;  %v6220_v37 = vld [vmem:[#allocation20_spill] sm:$0xff] }
  0xc8   :  { %4205 = vmatpush3.bf16.msra.mxu1 %v6210_v24  ;;  %4183 = vmatprep.subr.bf16.mxu0 %v4182_v39  ;;  %v6221_v39 = vand.u32 4294901760, %v5021_v7  ;;  %v6226_v7 = vand.u32 4294901760, %v5091_v38  ;;  %v6231_v38 = vand.u32 4294901760, %v5120_v10  ;;  %v6235_v10 = vand.u32 4294901760, %v5165_v18 }
  0xc9   :  { %4207 = vmatprep.subr.bf16.mxu1 %v6213_v44 }
  0xca   :  { %v4236_v33 = vpack.c.bf16 %v6226_v7, %v6225_v12  ;;  %v4244_v7 = vpack.c.bf16 %v6235_v10, %v6234_v60  ;;  %v133_v10 = vld [vmem:[#allocation5 + $0x2a8] sm:$0xff] }
  0xcb   :  { %4185 = vmatpush3.bf16.msra.mxu0 %v4184_v28  ;;  %v4232_v28 = vpack.c.bf16 %v6222_v11, %v6221_v39  ;;  %v4240_v39 = vpack.c.bf16 %v6231_v38, %v6230_v40  ;;  %v115_v40 = vld [vmem:[#allocation5 + $0x218] sm:$0xff]  ;;  %v6239_v38 = vand.u32 4294901760, %v5214_v52  ;;  %v6244_v52 = vand.u32 4294901760, %v5261_v6 }
  0xcc   :  { %4209 = vmatpush3.bf16.msra.mxu1 %v6214_v56  ;;  %4187 = vmatprep.subr.bf16.mxu0 %v4186_v49  ;;  %v6223_v49 = vand.u32 4294901760, %v5077_v21  ;;  %v6228_v21 = vand.u32 4294901760, %v5105_v3  ;;  %v6232_v3 = vand.u32 4294901760, %v5136_v26  ;;  %v114_v26 = vld [vmem:[#allocation5 + $0x210] sm:$0xff]  ;;  %v6246_v6 = vand.u32 4294901760, %v5276_v58 }
  0xcd   :  { %4211 = vmatprep.subr.bf16.mxu1 %v6215_v53  ;;  %v6250_v58 = vand.u32 4294901760, %v5334_v54 }
  0xcf   :  { %4189 = vmatpush3.bf16.msra.mxu0 %v4188_v32  ;;  %v6224_v32 = vand.u32 4294901760, %v5079_v25  ;;  %v6229_v25 = vand.u32 4294901760, %v5107_v63  ;;  %v6233_v63 = vand.u32 4294901760, %v5138_v9  ;;  %v6238_v9 = vand.u32 4294901760, %v5203_v30 }
  0xd0   :  { %4213 = vmatpush3.bf16.msra.mxu1 %v6216_v47  ;;  %4191 = vmatprep.subr.bf16.mxu0 %v4190_v0  ;;  %v6243_v30 = vand.u32 4294901760, %v5242_v51  ;;  %v46_v51 = vld [vmem:[#allocation2 + $0x28] sm:$0xff] }
  0xd1   :  { %4215 = vmatprep.subr.bf16.mxu1 %v6217_v31  ;;  %v4234_v0 = vpack.c.bf16 %v6224_v32, %v6223_v49  ;;  %v131_v49 = vld [vmem:[#allocation5 + $0x298] sm:$0xff]  ;;  %v4242_v32 = vpack.c.bf16 %v6233_v63, %v6232_v3  ;;  %v4248_v3 = vpack.c.bf16 %v6239_v38, %v6238_v9 }
  0xd2   :  { %v1939_v60 = vand.u32 4294901760, %v131_v49 }
  0xd3   :  { %4193 = vmatpush3.bf16.msra.mxu0 %v4192_v2  ;;  %v6227_v2 = vld [vmem:[#allocation13_spill] sm:$0xff] }
  0xd4   :  { %4217 = vmatpush3.bf16.msra.mxu1 %v5212_v61  ;;  %4195 = vmatprep.subr.bf16.mxu0 %v4194_v57  ;;  %v4238_v57 = vpack.c.bf16 %v6229_v25, %v6228_v21  ;;  %v6237_v21 = vand.u32 4294901760, %v5191_v17  ;;  %v6242_v17 = vand.u32 4294901760, %v5240_v16  ;;  %v1888_v16 = vand.u32 4294901760, %v114_v26 }
  0xd5   :  { %4219 = vmatprep.subr.bf16.mxu1 %v6220_v37  ;;  %v5528_v38 = vsub.f32 %v131_v49, %v1939_v60  ;;  %v135_v49 = vld [vmem:[#allocation5 + $0x2b8] sm:$0xff] }
  0xd7   :  { %4197 = vmatpush3.bf16.msra.mxu0 %v4196_v45  ;;  %v129_v45 = vld [vmem:[#allocation5 + $0x288] sm:$0xff] }
  0xd8   :  { %4221 = vmatpush3.bf16.msra.mxu1 %v5234_v20  ;;  %4231 = vmatprep.subr.bf16.mxu0 %v4230_v23  ;;  %v113_v23 = vld [vmem:[#allocation5 + $0x208] sm:$0xff]  ;;  %v1933_v11 = vand.u32 4294901760, %v129_v45 }
  0xd9   :  { %4223 = vmatprep.subr.bf16.mxu1 %v5267_v55  ;;  %v1885_v12 = vand.u32 4294901760, %v113_v23 }
  0xda   :  { %1496 = vmatmul.mubr.f32.vlgmr.msra.gmra.mrb[8].mxu0 %v5319_v46 }
  0xdb   :  { %4233 = vmatpush3.bf16.msra.mxu0 %v4232_v28  ;;  %1770 = vmatprep.mubr.f32.mxu0 %v6227_v2  ;;  %v130_v28 = vld [vmem:[#allocation5 + $0x290] sm:$0xff] }
  0xdc   :  { %4225 = vmatpush3.bf16.msra.mxu1 %v5348_v13  ;;  %4235 = vmatprep.subr.bf16.mxu0 %v4234_v0  ;;  %v1882_v0 = vand.u32 4294901760, %v112_v15  ;;  %v1936_v63 = vand.u32 4294901760, %v130_v28 }
  0xdd   :  { %4227 = vmatprep.subr.bf16.mxu1 %v5350_v22 }
  0xde   :  { %v5501_v46 = vsub.f32 %v112_v15, %v1882_v0 }
  0xdf   :  { %4237 = vmatpush3.bf16.msra.mxu0 %v4236_v33  ;;  %v6236_v33 = vand.u32 4294901760, %v5173_v35  ;;  %v132_v35 = vld [vmem:[#allocation5 + $0x2a0] sm:$0xff] }
  0xe0   :  { %4229 = vmatpush3.bf16.msra.mxu1 %v5373_v50  ;;  %4239 = vmatprep.subr.bf16.mxu0 %v4238_v57  ;;  %v5474_v57 = vsub.f32 %v128_v43, %v1930_v34  ;;  %v5490_v43 = vpack.c.bf16 %v6243_v30, %v6242_v17  ;;  %v6093_v17 = vand.u32 4294901760, %v5528_v38 }
  0xe1   :  { %4263 = vmatprep.subr.bf16.mxu1 %v5065_v19  ;;  %v4246_v25 = vpack.c.bf16 %v6237_v21, %v6236_v33  ;;  %v6240_v19 = vand.u32 4294901760, %v6211_v42  ;;  %v6245_v42 = vand.u32 4294901760, %v5269_v62  ;;  %v5498_v33 = vsub.f32 %v129_v45, %v1933_v11 }
  0xe2   :  { %v6247_v62 = vand.u32 4294901760, %v5305_v36  ;;  %v1942_v45 = vand.u32 4294901760, %v132_v35  ;;  %v6103_v15 = vand.u32 4294901760, %v5474_v57  ;;  %v5526_v36 = vsub.f32 %v130_v28, %v1936_v63 }
  0xe3   :  { %v4250_v18 = vpack.c.bf16 %v6241_v14, %v6240_v19  ;;  %1604 = vmatmul.mubr.f32.vlgmr.msra.gmra.mrb[8].mxu1 %v1123_v4  ;;  %4241 = vmatpush3.bf16.msra.mxu0 %v4240_v39  ;;  %v5496_v8 = vpack.c.bf16 %v6245_v42, %v6244_v52  ;;  %v5503_v4 = vsub.f32 %v113_v23, %v1885_v12  ;;  %v1891_v39 = vand.u32 4294901760, %v115_v40 }
  0xe4   :  { %4265 = vmatpush3.bf16.msra.mxu1 %v6207_v29  ;;  %4243 = vmatprep.subr.bf16.mxu0 %v4242_v32  ;;  %v5510_v21 = vpack.c.bf16 %v6247_v62, %v6246_v6  ;;  %v1945_v29 = vand.u32 4294901760, %v133_v10  ;;  %v6248_v23 = vand.u32 4294901760, %v5314_v1  ;;  %v5532_v19 = vpack.c.bf16 %v1885_v12, %v1882_v0  ;;  %v116_v1 = vld [vmem:[#allocation5 + $0x220] sm:$0xff] }
  0xe5   :  { %4267 = vmatprep.subr.bf16.mxu1 %v6208_v5  ;;  %1874 = vmatprep.mubr.f32.mxu1 %v6227_v2  ;;  %v6249_v5 = vand.u32 4294901760, %v5331_v48  ;;  %v5530_v2 = vpack.c.bf16 %v1933_v11, %v1930_v34  ;;  %v6101_v41 = vand.u32 4294901760, %v5498_v33  ;;  %v5535_v14 = vand.u32 4294901760, %v46_v51  ;;  %v134_v11 = vld [vmem:[#allocation5 + $0x2b0] sm:$0xff] }
  0xe6   :  { %v5518_v32 = vpack.c.bf16 %v6248_v23, %v1344_v59  ;;  %6251 = vst [vmem:[#allocation11_spill] sm:$0xff] %v5532_v19  ;;  %v117_v59 = vld [vmem:[#allocation5 + $0x228] sm:$0xff]  ;;  %v5538_v48 = vpack.c.bf16 %v1939_v60, %v1936_v63  ;;  %v5540_v54 = vpack.c.bf16 %v1891_v39, %v1888_v16  ;;  %v6098_v28 = vand.u32 4294901760, %v5501_v46 }
  0xe7   :  { %v5524_v9 = vpack.c.bf16 %v6250_v58, %v6249_v5  ;;  %4245 = vmatpush3.bf16.msra.mxu0 %v4244_v7  ;;  %6252 = vst [vmem:[#allocation12_spill] sm:$0xff] %v5535_v14  ;;  %v6097_v34 = vand.u32 4294901760, %v5503_v4  ;;  %v5545_v0 = vsub.f32 %v114_v26, %v1888_v16  ;;  %v5547_v12 = vsub.f32 %v115_v40, %v1891_v39 }
  0xe8   :  { %4269 = vmatpush3.bf16.msra.mxu1 %v6210_v24  ;;  %4247 = vmatprep.subr.bf16.mxu0 %v4246_v25  ;;  %6253 = vst [vmem:[#allocation16_spill] sm:$0xff] %v5538_v48  ;;  %6254 = vst [vmem:[#allocation21_spill] sm:$0xff] %v5540_v54  ;;  %v5549_v7 = vpack.c.bf16 %v1945_v29, %v1942_v45  ;;  %v2109_v24 = vsub.f32 %v5474_v57, %v6103_v15  ;;  %v1894_v25 = vand.u32 4294901760, %v116_v1 }
  0xe9   :  { %4271 = vmatprep.subr.bf16.mxu1 %v6213_v44  ;;  %v1897_v63 = vand.u32 4294901760, %v117_v59  ;;  %v6094_v60 = vand.u32 4294901760, %v5526_v36  ;;  %v2116_v44 = vsub.f32 %v5498_v33, %v6101_v41  ;;  %v1948_v26 = vand.u32 4294901760, %v134_v11 }
  0xea   :  { %6255 = vst [vmem:[#allocation22_spill] sm:$0xff] %v5549_v7  ;;  %v1951_v40 = vand.u32 4294901760, %v135_v49  ;;  %v5560_v30 = vsub.f32 %v46_v51, %v5535_v14  ;;  %v5563_v52 = vsub.f32 %v132_v35, %v1942_v45  ;;  %v1997_v42 = vsub.f32 %v5501_v46, %v6098_v28  ;;  %v118_v51 = vld [vmem:[#allocation5 + $0x230] sm:$0xff]  ;;  %v121_v28 = vld [vmem:[#allocation5 + $0x248] sm:$0xff] }
  0xeb   :  { %4249 = vmatpush3.bf16.msra.mxu0 %v4248_v3  ;;  %v2004_v3 = vsub.f32 %v5503_v4, %v6097_v34  ;;  %v5572_v16 = vsub.f32 %v133_v10, %v1945_v29  ;;  %v2110_v39 = vand.u32 4294901760, %v2109_v24  ;;  %v6096_v6 = vand.u32 4294901760, %v5545_v0  ;;  %v119_v10 = vld [vmem:[#allocation5 + $0x238] sm:$0xff] }
  0xec   :  { %4273 = vmatpush3.bf16.msra.mxu1 %v6214_v56  ;;  %4251 = vmatprep.subr.bf16.mxu0 %v4250_v18  ;;  %v6095_v56 = vand.u32 4294901760, %v5547_v12  ;;  %v5576_v18 = vpack.c.bf16 %v1897_v63, %v1894_v25  ;;  %v5578_v35 = vsub.f32 %v116_v1, %v1894_v25  ;;  %v2123_v62 = vsub.f32 %v5526_v36, %v6094_v60  ;;  %v137_v60 = vld [vmem:[#allocation5 + $0x2c8] sm:$0xff] }
  0xed   :  { %4275 = vmatprep.subr.bf16.mxu1 %v6215_v53  ;;  %v2130_v53 = vsub.f32 %v5528_v38, %v6093_v17  ;;  %v2117_v45 = vand.u32 4294901760, %v2116_v44  ;;  %v5587_v29 = vsub.f32 %v117_v59, %v1897_v63  ;;  %v5589_v23 = vpack.c.bf16 %v1951_v40, %v1948_v26  ;;  %v136_v17 = vld [vmem:[#allocation5 + $0x2c0] sm:$0xff] }
  0xee   :  { %6256 = vst [vmem:[#allocation14_spill] sm:$0xff] %v5576_v18  ;;  %v6104_v5 = vand.u32 4294901760, %v5560_v30  ;;  %v1998_v58 = vand.u32 4294901760, %v1997_v42  ;;  %v2005_v1 = vand.u32 4294901760, %v2004_v3  ;;  %v5594_v24 = vsub.f32 %v134_v11, %v1948_v26  ;;  %v120_v42 = vld [vmem:[#allocation5 + $0x240] sm:$0xff] }
  0xef   :  { %4253 = vmatpush3.bf16.msra.mxu0 %v5490_v43  ;;  %6257 = vst [vmem:[#allocation15_spill] sm:$0xff] %v5589_v23  ;;  %v1900_v25 = vand.u32 4294901760, %v118_v51  ;;  %v5597_v43 = vsub.f32 %v135_v49, %v1951_v40  ;;  %v1903_v59 = vand.u32 4294901760, %v119_v10  ;;  %v2011_v63 = vsub.f32 %v5545_v0, %v6096_v6 }
  0xf0   :  { %4277 = vmatpush3.bf16.msra.mxu1 %v6216_v47  ;;  %4255 = vmatprep.subr.bf16.mxu0 %v5496_v8  ;;  %v2018_v47 = vsub.f32 %v5547_v12, %v6095_v56  ;;  %v2124_v8 = vand.u32 4294901760, %v2123_v62  ;;  %v2131_v44 = vand.u32 4294901760, %v2130_v53  ;;  %v6100_v11 = vand.u32 4294901760, %v5563_v52 }
  0xf1   :  { %4279 = vmatprep.subr.bf16.mxu1 %v6217_v31  ;;  %v6099_v26 = vand.u32 4294901760, %v5572_v16  ;;  %v5608_v31 = vpack.c.bf16 %v2117_v45, %v2110_v39  ;;  %v1954_v49 = vand.u32 4294901760, %v136_v17  ;;  %v1957_v40 = vand.u32 4294901760, %v137_v60 }
  0xf2   :  { %v1980_v3 = vsub.f32 %v5560_v30, %v6104_v5  ;;  %v5615_v62 = vpack.c.bf16 %v2005_v1, %v1998_v58  ;;  %v5617_v53 = vsub.f32 %v118_v51, %v1900_v25  ;;  %v6102_v56 = vand.u32 4294901760, %v5578_v35  ;;  %v139_v1 = vld [vmem:[#allocation5 + $0x2d8] sm:$0xff] }
  0xf3   :  { %4257 = vmatpush3.bf16.msra.mxu0 %v5510_v21  ;;  %v6105_v21 = vand.u32 4294901760, %v5587_v29  ;;  %v5622_v39 = vpack.c.bf16 %v1903_v59, %v1900_v25  ;;  %v5624_v45 = vsub.f32 %v119_v10, %v1903_v59  ;;  %v2012_v6 = vand.u32 4294901760, %v2011_v63  ;;  %v138_v10 = vld [vmem:[#allocation5 + $0x2d0] sm:$0xff]  ;;  %v123_v5 = vld [vmem:[#allocation5 + $0x258] sm:$0xff] }
  0xf4   :  { %4281 = vmatpush3.bf16.msra.mxu1 %v5212_v61  ;;  %4259 = vmatprep.subr.bf16.mxu0 %v5518_v32  ;;  %v2019_v34 = vand.u32 4294901760, %v2018_v47  ;;  %v5626_v61 = vpack.c.bf16 %v2131_v44, %v2124_v8  ;;  %v2137_v32 = vsub.f32 %v5563_v52, %v6100_v11  ;;  %v2144_v51 = vsub.f32 %v5572_v16, %v6099_v26 }
  0xf5   :  { %4283 = vmatprep.subr.bf16.mxu1 %v6220_v37  ;;  %6258 = vst [vmem:[#allocation17_spill] sm:$0xff] %v5622_v39  ;;  %v1906_v58 = vand.u32 4294901760, %v120_v42  ;;  %v5635_v37 = vpack.c.bf16 %v1957_v40, %v1954_v49  ;;  %v6107_v25 = vand.u32 4294901760, %v5594_v24  ;;  %v6106_v59 = vand.u32 4294901760, %v5597_v43 }
  0xf6   :  { %v1981_v63 = vand.u32 4294901760, %v1980_v3  ;;  %v5641_v47 = vsub.f32 %v136_v17, %v1954_v49  ;;  %v1909_v8 = vand.u32 4294901760, %v121_v28  ;;  %v2032_v44 = vsub.f32 %v5587_v29, %v6105_v21 }
  0xf7   :  { %4261 = vmatpush3.bf16.msra.mxu0 %v5524_v9  ;;  %6259 = vst [vmem:[#allocation18_spill] sm:$0xff] %v5635_v37  ;;  %v2025_v9 = vsub.f32 %v5578_v35, %v6102_v56  ;;  %v5650_v26 = vpack.c.bf16 %v2019_v34, %v2012_v6  ;;  %v5652_v3 = vsub.f32 %v137_v60, %v1957_v40  ;;  %v6110_v11 = vand.u32 4294901760, %v5617_v53 }
  0xf8   :  { %4285 = vmatpush3.bf16.msra.mxu1 %v5234_v20  ;;  %4295 = vmatprep.subr.bf16.mxu0 %v5530_v2  ;;  %v122_v20 = vld [vmem:[#allocation5 + $0x250] sm:$0xff]  ;;  %v6113_v17 = vand.u32 4294901760, %v5624_v45  ;;  %v2138_v49 = vand.u32 4294901760, %v2137_v32  ;;  %v2145_v41 = vand.u32 4294901760, %v2144_v51  ;;  %v1960_v56 = vand.u32 4294901760, %v138_v10 }
  0xf9   :  { %4287 = vmatprep.subr.bf16.mxu1 %v5267_v55  ;;  %v1963_v15 = vand.u32 4294901760, %v139_v1  ;;  %v5658_v21 = vsub.f32 %v120_v42, %v1906_v58  ;;  %v2151_v55 = vsub.f32 %v5594_v24, %v6107_v25  ;;  %v2158_v34 = vsub.f32 %v5597_v43, %v6106_v59  ;;  %v140_v59 = vld [vmem:[#allocation5 + $0x2e0] sm:$0xff] }
  0xfa   :  { %1772 = vmatmul.mubr.f32.vlgmr.msra.gmra.mrb[10].mxu0 %v5291_v27  ;;  %v5668_v60 = vpack.c.bf16 %v1909_v8, %v1906_v58  ;;  %v2026_v6 = vand.u32 4294901760, %v2025_v9  ;;  %v2033_v40 = vand.u32 4294901760, %v2032_v44  ;;  %v1912_v32 = vand.u32 4294901760, %v122_v20  ;;  %v5696_v25 = vld [vmem:[#allocation5 + $0x260] sm:$0xff] }
  0xfb   :  { %4297 = vmatpush3.bf16.msra.mxu0 %v5532_v19  ;;  %1982 = vmatprep.mubr.f32.mxu0 %v1981_v63  ;;  %v1915_v42 = vand.u32 4294901760, %v123_v5  ;;  %v2039_v51 = vsub.f32 %v5617_v53, %v6110_v11  ;;  %v2046_v63 = vsub.f32 %v5624_v45, %v6113_v17  ;;  %v5678_v58 = vpack.c.bf16 %v2145_v41, %v2138_v49 }
  0xfc   :  { %4289 = vmatpush3.bf16.msra.mxu1 %v5348_v13  ;;  %4299 = vmatprep.subr.bf16.mxu0 %v5538_v48  ;;  %v141_v13 = vld [vmem:[#allocation5 + $0x2e8] sm:$0xff]  ;;  %v5680_v9 = vsub.f32 %v121_v28, %v1909_v8  ;;  %v5682_v44 = vpack.c.bf16 %v1963_v15, %v1960_v56  ;;  %v5686_v48 = vsub.f32 %v138_v10, %v1960_v56  ;;  %v2152_v19 = vand.u32 4294901760, %v2151_v55 }
  0xfd   :  { %4291 = vmatprep.subr.bf16.mxu1 %v5350_v22  ;;  %v6114_v22 = vand.u32 4294901760, %v5652_v3  ;;  %v5688_v11 = vsub.f32 %v139_v1, %v1963_v15  ;;  %v2159_v17 = vand.u32 4294901760, %v2158_v34  ;;  %v5692_v41 = vpack.c.bf16 %v2033_v40, %v2026_v6  ;;  %v5704_v55 = vld [vmem:[#allocation5 + $0x268] sm:$0xff]  ;;  %v5713_v40 = vld [vmem:[#allocation5 + $0x2f0] sm:$0xff] }
  0xfe   :  { %6260 = vst [vmem:[#allocation19_spill] sm:$0xff] %v5686_v48  ;;  %v5694_v28 = vsub.f32 %v122_v20, %v1912_v32  ;;  %v1966_v8 = vand.u32 4294901760, %v140_v59  ;;  %v1969_v49 = vand.u32 4294901760, %v141_v13  ;;  %v5699_v56 = vpack.c.bf16 %v1915_v42, %v1912_v32  ;;  %v5715_v32 = vld [vmem:[#allocation5 + $0x2f8] sm:$0xff] }
  0xff   :  { %4301 = vmatpush3.bf16.msra.mxu0 %v5540_v54  ;;  %6261 = vst [vmem:[#allocation20_spill] sm:$0xff] %v5688_v11  ;;  %v2040_v15 = vand.u32 4294901760, %v2039_v51  ;;  %v2047_v10 = vand.u32 4294901760, %v2046_v63  ;;  %v6262_v1 = vand.u32 4294901760, %v5641_v47  ;;  %v5706_v34 = vsub.f32 %v123_v5, %v1915_v42 }
 0x100   :  { %4293 = vmatpush3.bf16.msra.mxu1 %v5373_v50  ;;  %4303 = vmatprep.subr.bf16.mxu0 %v5549_v7  ;;  %v2172_v20 = vsub.f32 %v5652_v3, %v6114_v22  ;;  %v4338_v51 = vpack.c.bf16 %v2159_v17, %v2152_v19  ;;  %v1918_v5 = vand.u32 4294901760, %v5696_v25  ;;  %v5724_v22 = vpack.c.bf16 %v1969_v49, %v1966_v8 }
 0x101   :  { %4327 = vmatprep.subr.bf16.mxu1 %v5608_v31  ;;  %v2165_v50 = vsub.f32 %v5641_v47, %v6262_v1  ;;  %v45_v1 = vld [vmem:[#allocation2 + $0x20] sm:$0xff]  ;;  %v5726_v31 = vsub.f32 %v140_v59, %v1966_v8  ;;  %v5728_v6 = vsub.f32 %v141_v13, %v1969_v49  ;;  %v4340_v19 = vpack.c.bf16 %v2047_v10, %v2040_v15 }
 0x102   :  { %v1972_v42 = vand.u32 4294901760, %v5713_v40  ;;  %v1975_v63 = vand.u32 4294901760, %v5715_v32  ;;  %v2173_v59 = vand.u32 4294901760, %v2172_v20  ;;  %v6263_v13 = vand.u32 4294901760, %v5658_v21 }
 0x103   :  { %1876 = vmatmul.mubr.f32.vlgmr.msra.gmra.mrb[10].mxu1 %v5291_v27  ;;  %4305 = vmatpush3.bf16.msra.mxu0 %v5576_v18  ;;  %v1921_v27 = vand.u32 4294901760, %v5704_v55  ;;  %v2166_v17 = vand.u32 4294901760, %v2165_v50  ;;  %v5734_v18 = vld [vmem:[#allocation5 + $0x270] sm:$0xff]  ;;  %v6264_v49 = vand.u32 4294901760, %v5680_v9  ;;  %v5745_v15 = vand.u32 4294901760, %v45_v1 }
 0x104   :  { %4329 = vmatpush3.bf16.msra.mxu1 %v5615_v62  ;;  %4307 = vmatprep.subr.bf16.mxu0 %v5589_v23  ;;  %v5736_v62 = vld [vmem:[#allocation5 + $0x278] sm:$0xff]  ;;  %v2053_v8 = vsub.f32 %v5658_v21, %v6263_v13  ;;  %v6265_v10 = vand.u32 4294901760, %v5686_v48  ;;  %v6266_v23 = vand.u32 4294901760, %v5688_v11  ;;  %v5771_v13 = vsub.f32 %v5715_v32, %v1975_v63 }
 0x105   :  { %4331 = vmatprep.subr.bf16.mxu1 %v5626_v61  ;;  %2218 = vmatprep.mubr.f32.mxu1 %v5535_v14  ;;  %v2060_v61 = vsub.f32 %v5680_v9, %v6264_v49  ;;  %v5759_v49 = vsub.f32 %v5696_v25, %v1918_v5  ;;  %v1927_v7 = vand.u32 4294901760, %v5736_v62  ;;  %v6133_v25 = vand.u32 4294901760, %v5728_v6 }
 0x106   :  { %v2179_v50 = vsub.f32 %v5686_v48, %v6265_v10  ;;  %v2186_v20 = vsub.f32 %v5688_v11, %v6266_v23  ;;  %v1924_v10 = vand.u32 4294901760, %v5734_v18  ;;  %v5768_v23 = vsub.f32 %v5713_v40, %v1972_v42 }
 0x107   :  { %4309 = vmatpush3.bf16.msra.mxu0 %v5622_v39  ;;  %v5762_v39 = vsub.f32 %v5704_v55, %v1921_v27  ;;  %v4342_v14 = vpack.c.bf16 %v2173_v59, %v2166_v17  ;;  %v2061_v55 = vand.u32 4294901760, %v2060_v61  ;;  %v5776_v11 = vsub.f32 %v45_v1, %v5745_v15 }
 0x108   :  { %4333 = vmatpush3.bf16.msra.mxu1 %v5650_v26  ;;  %4311 = vmatprep.subr.bf16.mxu0 %v5635_v37  ;;  %v2054_v37 = vand.u32 4294901760, %v2053_v8  ;;  %v2180_v48 = vand.u32 4294901760, %v2179_v50  ;;  %v6267_v40 = vand.u32 4294901760, %v5694_v28  ;;  %v6268_v32 = vand.u32 4294901760, %v5706_v34 }
 0x109   :  { %4335 = vmatprep.subr.bf16.mxu1 %v5678_v58  ;;  %v2187_v58 = vand.u32 4294901760, %v2186_v20  ;;  %v5788_v17 = vsub.f32 %v5734_v18, %v1924_v10  ;;  %v5791_v1 = vsub.f32 %v5736_v62, %v1927_v7  ;;  %v6269_v61 = vand.u32 4294901760, %v5726_v31 }
 0x10a   :  { %v2067_v54 = vsub.f32 %v5694_v28, %v6267_v40  ;;  %v2074_v26 = vsub.f32 %v5706_v34, %v6268_v32  ;;  %v6135_v18 = vand.u32 4294901760, %v5771_v13  ;;  %v5803_v40 = vpack.c.bf16 %v1921_v27, %v1918_v5 }
 0x10b   :  { %4313 = vmatpush3.bf16.msra.mxu0 %v5668_v60  ;;  %v2193_v50 = vsub.f32 %v5726_v31, %v6269_v61  ;;  %v5805_v62 = vpack.c.bf16 %v1975_v63, %v1972_v42  ;;  %v6137_v32 = vand.u32 4294901760, %v5776_v11  ;;  %v4346_v8 = vpack.c.bf16 %v2187_v58, %v2180_v48 }
 0x10c   :  { %4337 = vmatpush3.bf16.msra.mxu1 %v5692_v41  ;;  %4315 = vmatprep.subr.bf16.mxu0 %v5682_v44  ;;  %v2200_v41 = vsub.f32 %v5728_v6, %v6133_v25  ;;  %v2068_v59 = vand.u32 4294901760, %v2067_v54  ;;  %v2075_v61 = vand.u32 4294901760, %v2074_v26  ;;  %v6270_v25 = vand.u32 4294901760, %v5759_v49 }
 0x10d   :  { %4339 = vmatprep.subr.bf16.mxu1 %v4338_v51  ;;  %v4344_v51 = vpack.c.bf16 %v2061_v55, %v2054_v37  ;;  %v6271_v5 = vand.u32 4294901760, %v5762_v39  ;;  %v6134_v63 = vand.u32 4294901760, %v5788_v17  ;;  %v6136_v27 = vand.u32 4294901760, %v5791_v1 }
 0x10e   :  { %v2081_v20 = vsub.f32 %v5759_v49, %v6270_v25  ;;  %v2194_v37 = vand.u32 4294901760, %v2193_v50  ;;  %v2201_v48 = vand.u32 4294901760, %v2200_v41  ;;  %v6272_v54 = vand.u32 4294901760, %v5768_v23 }
 0x10f   :  { %4317 = vmatpush3.bf16.msra.mxu0 %v5699_v56  ;;  %v2088_v42 = vsub.f32 %v5762_v39, %v6271_v5  ;;  %v2214_v26 = vsub.f32 %v5771_v13, %v6135_v18  ;;  %v1986_v25 = vsub.f32 %v5776_v11, %v6137_v32  ;;  %v5828_v55 = vpack.c.bf16 %v1927_v7, %v1924_v10 }
 0x110   :  { %4341 = vmatpush3.bf16.msra.mxu1 %v4340_v19  ;;  %4319 = vmatprep.subr.bf16.mxu0 %v5724_v22  ;;  %v2207_v19 = vsub.f32 %v5768_v23, %v6272_v54  ;;  %v4348_v58 = vpack.c.bf16 %v2075_v61, %v2068_v59  ;;  %v2082_v50 = vand.u32 4294901760, %v2081_v20  ;;  %v2095_v5 = vsub.f32 %v5788_v17, %v6134_v63 }
 0x111   :  { %4343 = vmatprep.subr.bf16.mxu1 %v4342_v14  ;;  %v4358_v14 = vpack.c.bf16 %v5498_v33, %v5474_v57  ;;  %v2089_v41 = vand.u32 4294901760, %v2088_v42  ;;  %v2102_v54 = vsub.f32 %v5791_v1, %v6136_v27  ;;  %v4350_v7 = vpack.c.bf16 %v2201_v48, %v2194_v37 }
 0x112   :  { %v2208_v10 = vand.u32 4294901760, %v2207_v19  ;;  %v2215_v59 = vand.u32 4294901760, %v2214_v26  ;;  %v1987_v61 = vand.u32 4294901760, %v1986_v25  ;;  %v4362_v42 = vpack.c.bf16 %v5528_v38, %v5526_v36  ;;  %v6274_v25 = vld [vmem:[#allocation16_spill] sm:$0xff] }
 0x113   :  { %4321 = vmatpush3.bf16.msra.mxu0 %v5803_v40  ;;  %v4352_v20 = vpack.c.bf16 %v2089_v41, %v2082_v50  ;;  %v2096_v63 = vand.u32 4294901760, %v2095_v5  ;;  %v2103_v18 = vand.u32 4294901760, %v2102_v54  ;;  %v4366_v48 = vpack.c.bf16 %v5572_v16, %v5563_v52  ;;  %v6276_v50 = vld [vmem:[#allocation21_spill] sm:$0xff]  ;;  %v6277_v41 = vld [vmem:[#allocation19_spill] sm:$0xff]  ;;  %v6278_v5 = vld [vmem:[#allocation20_spill] sm:$0xff] }
 0x114   :  { %4345 = vmatpush3.bf16.msra.mxu1 %v4344_v51  ;;  %4323 = vmatprep.subr.bf16.mxu0 %v5805_v62  ;;  %v4360_v51 = vpack.c.bf16 %v5503_v4, %v5501_v46  ;;  %v4354_v27 = vpack.c.bf16 %v2215_v59, %v2208_v10  ;;  %v4368_v19 = vpack.c.bf16 %v5587_v29, %v5578_v35  ;;  %v6280_v59 = vld [vmem:[#allocation14_spill] sm:$0xff] }
 0x115   :  { %4347 = vmatprep.subr.bf16.mxu1 %v4346_v8  ;;  %v4364_v8 = vpack.c.bf16 %v5547_v12, %v5545_v0  ;;  %v4356_v37 = vpack.c.bf16 %v2103_v18, %v2096_v63  ;;  %v4370_v26 = vpack.c.bf16 %v5597_v43, %v5594_v24  ;;  %v4372_v18 = vpack.c.bf16 %v5624_v45, %v5617_v53  ;;  %v6273_v63 = vld [vmem:[#allocation11_spill] sm:$0xff] }
 0x116   :  { %v4378_v54 = vpack.c.bf16 %v6278_v5, %v6277_v41  ;;  %v4380_v10 = vpack.c.bf16 %v5706_v34, %v5694_v28 }
 0x117   :  { %4325 = vmatpush3.bf16.msra.mxu0 %v5828_v55 }
 0x118   :  { %4349 = vmatpush3.bf16.msra.mxu1 %v4348_v58  ;;  %4359 = vmatprep.subr.bf16.mxu0 %v4358_v14  ;;  %v6275_v58 = vand.u32 4294901760, %v5560_v30  ;;  %v4376_v14 = vpack.c.bf16 %v5680_v9, %v5658_v21 }
 0x119   :  { %4351 = vmatprep.subr.bf16.mxu1 %v4350_v7  ;;  %v6279_v7 = vld [vmem:[#allocation22_spill] sm:$0xff] }
 0x11a   :  { %1988 = vmatmul.mubr.f32.vlgmr.msra.gmra.mrb[12].mxu0 %v1987_v61  ;;  %v6281_v61 = vld [vmem:[#allocation15_spill] sm:$0xff] }
 0x11b   :  { %4361 = vmatpush3.bf16.msra.mxu0 %v4360_v51  ;;  %2355 = vmatprep.mubr.f32.mxu0 %v5560_v30  ;;  %v4382_v30 = vpack.c.bf16 %v5728_v6, %v5726_v31 }
 0x11c   :  { %4353 = vmatpush3.bf16.msra.mxu1 %v4352_v20  ;;  %4363 = vmatprep.subr.bf16.mxu0 %v4362_v42  ;;  %v4384_v42 = vpack.c.bf16 %v5762_v39, %v5759_v49 }
 0x11d   :  { %4355 = vmatprep.subr.bf16.mxu1 %v4354_v27  ;;  %v4374_v27 = vpack.c.bf16 %v5652_v3, %v5641_v47 }
 0x11f   :  { %4365 = vmatpush3.bf16.msra.mxu0 %v4364_v8 }
 0x120   :  { %4357 = vmatpush3.bf16.msra.mxu1 %v4356_v37  ;;  %4367 = vmatprep.subr.bf16.mxu0 %v4366_v48  ;;  %v6282_v37 = vld [vmem:[#allocation17_spill] sm:$0xff]  ;;  %v4386_v48 = vpack.c.bf16 %v5771_v13, %v5768_v23 }
 0x121   :  { %4391 = vmatprep.subr.bf16.mxu1 %v5530_v2 }
 0x123   :  { %2220 = vmatmul.mubr.f32.vlgmr.msra.gmra.mrb[12].mxu1 %v5745_v15  ;;  %4369 = vmatpush3.bf16.msra.mxu0 %v4368_v19  ;;  %v6283_v19 = vld [vmem:[#allocation18_spill] sm:$0xff] }
 0x124   :  { %4393 = vmatpush3.bf16.msra.mxu1 %v6273_v63  ;;  %4371 = vmatprep.subr.bf16.mxu0 %v4370_v26  ;;  %v3219_v26 = vld [vmem:[%s6000_s2] ss:$0 sm:$0xff]  ;;  %s4601_s2 = smov [#allocation7]  }
 0x125   :  { %4395 = vmatprep.subr.bf16.mxu1 %v6274_v25  ;;  %2462 = vmatprep.mubr.f32.mxu1 %v6275_v58  ;;  %v6285_v58 = vand.u32 4294901760, %v5498_v33  ;;  %v6289_v33 = vand.u32 4294901760, %v5528_v38  ;;  %v6294_v38 = vand.u32 4294901760, %v5572_v16  ;;  %v6300_v16 = vand.u32 4294901760, %v5617_v53  ;;  %s3209_s11 = sshll.u32 %s4601_s2, 4  ;;  %s3210_s11 = int_to_ptr.vmem [resolvable:$true] %s3209_s11 }
 0x126   :  { %s4566_s12 = scalar_lea.vmem %s3210_s11, 128  ;;  %p4571_p3 = scmp.lt.s32.totalorder %s3210_s11, %s3210_s11 }
 0x127   :  { %4373 = vmatpush3.bf16.msra.mxu0 %v4372_v18  ;;  %v4388_v18 = vpack.c.bf16 %v5791_v1, %v5788_v17  ;;  %p4567_p2 = scmp.ne.s32.totalorder %s3210_s11, %s4566_s12  ;;  %p4572_p4 = scmp.lt.s32.totalorder %s4566_s12, %s4566_s12 }
 0x128   :  { %4397 = vmatpush3.bf16.msra.mxu1 %v6276_v50  ;;  %4375 = vmatprep.subr.bf16.mxu0 %v4374_v27  ;;  %v6284_v27 = vand.u32 4294901760, %v5474_v57  ;;  %v6288_v57 = vand.u32 4294901760, %v5526_v36  ;;  %v6293_v36 = vand.u32 4294901760, %v5563_v52  ;;  %v6299_v52 = vand.u32 4294901760, %v5776_v11 }
 0x129   :  { %4399 = vmatprep.subr.bf16.mxu1 %v6279_v7  ;;  %p4573_p5 = por %p4572_p4, %p4571_p3 }
 0x12b   :  { %4377 = vmatpush3.bf16.msra.mxu0 %v4376_v14  ;;  %v4422_v14 = vpack.c.bf16 %v6285_v58, %v6284_v27  ;;  %v4430_v27 = vpack.c.bf16 %v6294_v38, %v6293_v36  ;;  %p4574_p6 = pnand %p4573_p5, %p4567_p2 }
 0x12c   :  { %4401 = vmatpush3.bf16.msra.mxu1 %v6280_v59  ;;  %4379 = vmatprep.subr.bf16.mxu0 %v4378_v54 }
 0x12d   :  { %4403 = vmatprep.subr.bf16.mxu1 %v6281_v61  ;;  %v3252_v51 = vpop.f32.mrb[0].mxu0 }
 0x12e   :  { %v3253_v20 = vpop.f32.mrb[1].mxu0 }
 0x12f   :  { %4381 = vmatpush3.bf16.msra.mxu0 %v4380_v10  ;;  %v3254_v8 = vadd.f32 %v3253_v20, %v3252_v51  ;;  %v6286_v51 = vand.u32 4294901760, %v5501_v46  ;;  %v6287_v20 = vand.u32 4294901760, %v5503_v4  ;;  %v6290_v46 = vand.u32 4294901760, %v5545_v0 }
 0x130   :  { %4405 = vmatpush3.bf16.msra.mxu1 %v6282_v37  ;;  %4383 = vmatprep.subr.bf16.mxu0 %v4382_v30  ;;  %v6291_v4 = vand.u32 4294901760, %v5547_v12  ;;  %v6296_v0 = vand.u32 4294901760, %v5587_v29  ;;  %v6297_v12 = vand.u32 4294901760, %v5594_v24  ;;  %v6303_v24 = vand.u32 4294901760, %v5652_v3 }
 0x131   :  { %4407 = vmatprep.subr.bf16.mxu1 %v6283_v19  ;;  %v266_v54 = vadd.f32 %v3254_v8, %v3219_v26  ;;  %v6308_v3 = vand.u32 4294901760, %v5694_v28 }
 0x132   :  { %v4428_v26 = vpack.c.bf16 %v6291_v4, %v6290_v46 }
 0x133   :  { %4385 = vmatpush3.bf16.msra.mxu0 %v4384_v42  ;;  %v4424_v42 = vpack.c.bf16 %v6287_v20, %v6286_v51  ;;  %v144_v51 = vld [vmem:[#allocation5 + $0x300] sm:$0xff]  ;;  %v145_v20 = vld [vmem:[#allocation5 + $0x308] sm:$0xff] }
 0x134   :  { %4409 = vmatpush3.bf16.msra.mxu1 %v5668_v60  ;;  %4387 = vmatprep.subr.bf16.mxu0 %v4386_v48  ;;  %v4426_v48 = vpack.c.bf16 %v6289_v33, %v6288_v57  ;;  %v2747_v46 = vand.u32 4294901760, %v145_v20 }
 0x135   :  { %4411 = vmatprep.subr.bf16.mxu1 %v5682_v44 }
 0x136   :  { %v3287_v10 = vpop.f32.mrb[0].mxu1 }
 0x137   :  { %v3288_v30 = vpop.f32.mrb[1].mxu1  ;;  %4389 = vmatpush3.bf16.msra.mxu0 %v4388_v18  ;;  %v6292_v18 = vld [vmem:[#allocation12_spill] sm:$0xff] }
 0x138   :  { %v3289_v32 = vadd.f32 %v3288_v30, %v3287_v10  ;;  %4413 = vmatpush3.bf16.msra.mxu1 %v5699_v56  ;;  %4423 = vmatprep.subr.bf16.mxu0 %v4422_v14  ;;  %v6298_v14 = vand.u32 4294901760, %v5597_v43  ;;  %v6302_v10 = vand.u32 4294901760, %v5641_v47  ;;  %v6307_v47 = vand.u32 4294901760, %v6278_v5 }
 0x139   :  { %4415 = vmatprep.subr.bf16.mxu1 %v5724_v22 }
 0x13a   :  { %v498_v8 = vadd.f32 %v3289_v32, %v266_v54  ;;  %2358 = vmatmul.mubr.f32.vlgmr.msra.gmra.mrb[14].mxu0 %v5776_v11  ;;  %v6295_v32 = vand.u32 4294901760, %v5578_v35  ;;  %v4434_v54 = vpack.c.bf16 %v6298_v14, %v6297_v12  ;;  %v6301_v35 = vand.u32 4294901760, %v5624_v45 }
 0x13b   :  { %4425 = vmatpush3.bf16.msra.mxu0 %v4424_v42  ;;  %2632 = vmatprep.mubr.f32.mxu0 %v6292_v18  ;;  %v4438_v43 = vpack.c.bf16 %v6303_v24, %v6302_v10  ;;  %v6305_v11 = vand.u32 4294901760, %v5680_v9  ;;  %v6306_v45 = vand.u32 4294901760, %v6277_v41  ;;  %v6311_v9 = vand.u32 4294901760, %v5728_v6  ;;  %v47_v41 = vld [vmem:[#allocation2 + $0x30] sm:$0xff] }
 0x13c   :  { %4417 = vmatpush3.bf16.msra.mxu1 %v5803_v40  ;;  %4427 = vmatprep.subr.bf16.mxu0 %v4426_v48  ;;  %v4432_v58 = vpack.c.bf16 %v6296_v0, %v6295_v32  ;;  %v4436_v29 = vpack.c.bf16 %v6301_v35, %v6300_v16  ;;  %v155_v57 = vsel %vm153_vm0, %v47_v41, 0  ;;  %v6314_v6 = vand.u32 4294901760, %v5768_v23 }
 0x13d   :  { %4419 = vmatprep.subr.bf16.mxu1 %v5805_v62  ;;  %v2744_v48 = vand.u32 4294901760, %v144_v51  ;;  %v2810_v4 = vand.u32 4294901760, %v155_v57 }
 0x13f   :  { %4429 = vmatpush3.bf16.msra.mxu0 %v4428_v26  ;;  %v2811_v23 = vsub.f32 %v155_v57, %v2810_v4 }
 0x140   :  { %4421 = vmatpush3.bf16.msra.mxu1 %v5828_v55  ;;  %4431 = vmatprep.subr.bf16.mxu0 %v4430_v27 }
 0x141   :  { %4455 = vmatprep.subr.bf16.mxu1 %v5530_v2  ;;  %v6304_v2 = vand.u32 4294901760, %v5658_v21  ;;  %v6310_v21 = vand.u32 4294901760, %v5726_v31  ;;  %v6315_v31 = vand.u32 4294901760, %v5771_v13 }
 0x143   :  { %2466 = vmatmul.mubr.f32.vlgmr.msra.gmra.mrb[14].mxu1 %v6299_v52  ;;  %4433 = vmatpush3.bf16.msra.mxu0 %v4432_v58  ;;  %v4440_v53 = vpack.c.bf16 %v6305_v11, %v6304_v2  ;;  %v4450_v33 = vpack.c.bf16 %v6315_v31, %v6314_v6 }
 0x144   :  { %4457 = vmatpush3.bf16.msra.mxu1 %v6273_v63  ;;  %4435 = vmatprep.subr.bf16.mxu0 %v4434_v54  ;;  %v4442_v63 = vpack.c.bf16 %v6307_v47, %v6306_v45 }
 0x145   :  { %4459 = vmatprep.subr.bf16.mxu1 %v6274_v25  ;;  %2736 = vmatprep.mubr.f32.mxu1 %v6292_v18  ;;  %v6309_v25 = vand.u32 4294901760, %v5706_v34  ;;  %v6312_v34 = vand.u32 4294901760, %v5759_v49  ;;  %v6316_v49 = vand.u32 4294901760, %v5788_v17  ;;  %v2822_v18 = vsub.f32 %v144_v51, %v2744_v48 }
 0x146   :  { %v4598_v17 = vmov 0.0|0.0  }
 0x147   :  { %4437 = vmatpush3.bf16.msra.mxu0 %v4436_v29  ;;  %v4444_v30 = vpack.c.bf16 %v6309_v25, %v6308_v3  ;;  %v2823_v36 = vand.u32 4294901760, %v2822_v18 }
 0x148   :  { %4461 = vmatpush3.bf16.msra.mxu1 %v6276_v50  ;;  %4439 = vmatprep.subr.bf16.mxu0 %v4438_v43  ;;  %v4446_v50 = vpack.c.bf16 %v6311_v9, %v6310_v21 }
 0x149   :  { %4463 = vmatprep.subr.bf16.mxu1 %v6279_v7  ;;  %v2824_v0 = vsub.f32 %v2822_v18, %v2823_v36 }
 0x14b   :  { %4441 = vmatpush3.bf16.msra.mxu0 %v4440_v53 }
 0x14c   :  { %4465 = vmatpush3.bf16.msra.mxu1 %v6280_v59  ;;  %4443 = vmatprep.subr.bf16.mxu0 %v4442_v63  ;;  %v6313_v59 = vand.u32 4294901760, %v5762_v39  ;;  %v6317_v39 = vand.u32 4294901760, %v5791_v1 }
 0x14d   :  { %v3322_v5 = vpop.f32.mrb[2].mxu0  ;;  %4467 = vmatprep.subr.bf16.mxu1 %v6281_v61 }
 0x14e   :  { %v3323_v7 = vpop.f32.mrb[3].mxu0  ;;  %v4448_v42 = vpack.c.bf16 %v6313_v59, %v6312_v34  ;;  %v4452_v26 = vpack.c.bf16 %v6317_v39, %v6316_v49 }
 0x14f   :  { %v3324_v28 = vadd.f32 %v3323_v7, %v3322_v5  ;;  %4445 = vmatpush3.bf16.msra.mxu0 %v4444_v30 }
 0x150   :  { %4469 = vmatpush3.bf16.msra.mxu1 %v6282_v37  ;;  %4447 = vmatprep.subr.bf16.mxu0 %v4446_v50  ;;  %v2829_v37 = vsub.f32 %v145_v20, %v2747_v46 }
 0x151   :  { %v636_v61 = vadd.f32 %v3324_v28, %v498_v8  ;;  %4471 = vmatprep.subr.bf16.mxu1 %v6283_v19  ;;  %v4487_v19 = vpack.c.bf16 %v2747_v46, %v2744_v48 }
 0x152   :  { %v2830_v38 = vand.u32 4294901760, %v2829_v37 }
 0x153   :  { %4449 = vmatpush3.bf16.msra.mxu0 %v4448_v42 }
 0x154   :  { %4473 = vmatpush3.bf16.msra.mxu1 %v5668_v60  ;;  %4451 = vmatprep.subr.bf16.mxu0 %v4450_v33  ;;  %v2812_v60 = vand.u32 4294901760, %v2811_v23  ;;  %v4499_v32 = vpack.c.bf16 %v2830_v38, %v2823_v36  ;;  %v2831_v58 = vsub.f32 %v2829_v37, %v2830_v38 }
 0x155   :  { %4475 = vmatprep.subr.bf16.mxu1 %v5682_v44  ;;  %v4600_v44 = vmov 0.0  }
 0x156   :  { %v3357_v13 = vpop.f32.mrb[2].mxu1  ;;  %v2832_v12 = vand.u32 4294901760, %v2831_v58 }
 0x157   :  { %v3358_v8 = vpop.f32.mrb[3].mxu1  ;;  %4453 = vmatpush3.bf16.msra.mxu0 %v4452_v26 }
 0x158   :  { %v3359_v27 = vadd.f32 %v3358_v8, %v3357_v13  ;;  %4477 = vmatpush3.bf16.msra.mxu1 %v5699_v56  ;;  %4495 = vmatprep.subr.bf16.mxu0 %v4598_v17  ;;  %v2825_v56 = vand.u32 4294901760, %v2824_v0 }
 0x159   :  { %4479 = vmatprep.subr.bf16.mxu1 %v5724_v22  ;;  %v2813_v22 = vsub.f32 %v2811_v23, %v2812_v60 }
 0x15a   :  { %v744_v1 = vadd.f32 %v3359_v27, %v636_v61  ;;  %2634 = vmatmul.mubr.f32.vlgmr.msra.gmra.mrb[16].mxu0 %v5745_v15 }
 0x15b   :  { %4497 = vmatpush3.bf16.msra.mxu0 %v4487_v19  ;;  %3893 = vmatprep.mubr.msk.f32.mxu0 %vm4599_vm1, %v4600_v44  ;;  %v2814_v14 = vand.u32 4294901760, %v2813_v22 }
 0x15c   :  { %4481 = vmatpush3.bf16.msra.mxu1 %v5803_v40  ;;  %4498 = vmatprep.subr.bf16.mxu0 %v4598_v17  ;;  %v4490_v40 = vpack.c.bf16 %v2832_v12, %v2825_v56 }
 0x15d   :  { %4483 = vmatprep.subr.bf16.mxu1 %v5805_v62  ;;  %v4493_v62 = vpack.c.bf16 %v2829_v37, %v2822_v18 }
 0x15e   :  { %3894 = vmatmul.mubr.f32.vlgmr.msra.gmra.mrb[18].mxu0 %v2812_v60 }
 0x15f   :  { %4500 = vmatpush3.bf16.msra.mxu0 %v4499_v32  ;;  %3900 = vmatprep.mubr.msk.f32.mxu0 %vm4599_vm1, %v4600_v44 }
 0x160   :  { %4485 = vmatpush3.bf16.msra.mxu1 %v5828_v55  ;;  %4501 = vmatprep.subr.bf16.mxu0 %v4598_v17 }
 0x161   :  { %4486 = vmatprep.subr.bf16.mxu1 %v4598_v17 }
 0x163   :  { %2738 = vmatmul.mubr.f32.vlgmr.msra.gmra.mrb[16].mxu1 %v5745_v15 }
 0x164   :  { %4488 = vmatpush3.bf16.msra.mxu1 %v4487_v19  ;;  %3872 = vmatprep.mubr.msk.f32.mxu1 %vm4599_vm1, %v4600_v44 }
 0x165   :  { %4489 = vmatprep.subr.bf16.mxu1 %v4598_v17 }
 0x166   :  { %3901 = vmatmul.mubr.f32.vlgmr.msra.gmra.mrb[18].mxu0 %v2810_v4 }
 0x167   :  { %3873 = vmatmul.mubr.f32.vlgmr.msra.gmra.mrb[18].mxu1 %v2814_v14  ;;  %4503 = vmatpush3.bf16.msra.mxu0 %v4487_v19 }
 0x168   :  { %4491 = vmatpush3.bf16.msra.mxu1 %v4490_v40  ;;  %3879 = vmatprep.mubr.msk.f32.mxu1 %vm4599_vm1, %v4600_v44 }
 0x169   :  { %3907 = vmatprep.mubr.msk.f32.mxu0 %vm4599_vm1, %v4600_v44  ;;  %4492 = vmatprep.subr.bf16.mxu1 %v4598_v17 }
 0x16d   :  { %v3392_v55 = vpop.f32.mrb[4].mxu0 }
 0x16e   :  { %v3393_v54 = vpop.f32.mrb[5].mxu0  ;;  %3908 = vmatmul.mubr.f32.vlgmr.msra.gmra.mrb[18].mxu0 %v2810_v4 }
 0x16f   :  { %v3394_v15 = vadd.f32 %v3393_v54, %v3392_v55  ;;  %3880 = vmatmul.mubr.f32.vlgmr.msra.gmra.mrb[18].mxu1 %v2810_v4 }
 0x170   :  { %4494 = vmatpush3.bf16.msra.mxu1 %v4493_v62  ;;  %3886 = vmatprep.mubr.msk.f32.mxu1 %vm4599_vm1, %v4600_v44 }
 0x171   :  { %v912_v52 = vadd.f32 %v3394_v15, %v744_v1 }
 0x176   :  { %v3427_v16 = vpop.f32.mrb[4].mxu1 }
 0x177   :  { %v3428_v35 = vpop.f32.mrb[5].mxu1  ;;  %3887 = vmatmul.mubr.f32.vlgmr.msra.gmra.mrb[18].mxu1 %v2811_v23 }
 0x178   :  { %v3429_v29 = vadd.f32 %v3428_v35, %v3427_v16 }
 0x17a   :  { %v1016_v10 = vadd.f32 %v3429_v29, %v912_v52 }
 0x18d   :  { %v3462_v24 = vpop.f32.mrb[6].mxu0 }
 0x18e   :  { %v3463_v43 = vpop.f32.mrb[7].mxu0 }
 0x18f   :  { %v3464_v2 = vadd.f32 %v3463_v43, %v3462_v24 }
 0x191   :  { %v1128_v11 = vadd.f32 %v3464_v2, %v1016_v10 }
 0x196   :  { %v3497_v53 = vpop.f32.mrb[6].mxu1 }
 0x197   :  { %v3498_v45 = vpop.f32.mrb[7].mxu1 }
 0x198   :  { %v3499_v47 = vadd.f32 %v3498_v45, %v3497_v53 }
 0x19a   :  { %v1360_v63 = vadd.f32 %v3499_v47, %v1128_v11 }
 0x1ad   :  { %v3532_v3 = vpop.f32.mrb[8].mxu0 }
 0x1ae   :  { %v3533_v25 = vpop.f32.mrb[9].mxu0 }
 0x1af   :  { %v3534_v30 = vadd.f32 %v3533_v25, %v3532_v3 }
 0x1b1   :  { %v1498_v21 = vadd.f32 %v3534_v30, %v1360_v63 }
 0x1b6   :  { %v3567_v9 = vpop.f32.mrb[8].mxu1 }
 0x1b7   :  { %v3568_v50 = vpop.f32.mrb[9].mxu1 }
 0x1b8   :  { %v3569_v41 = vadd.f32 %v3568_v50, %v3567_v9 }
 0x1ba   :  { %v1606_v5 = vadd.f32 %v3569_v41, %v1498_v21 }
 0x1cd   :  { %v3602_v7 = vpop.f32.mrb[10].mxu0 }
 0x1ce   :  { %v3603_v51 = vpop.f32.mrb[11].mxu0 }
 0x1cf   :  { %v3604_v20 = vadd.f32 %v3603_v51, %v3602_v7 }
 0x1d1   :  { %v1774_v28 = vadd.f32 %v3604_v20, %v1606_v5 }
 0x1d6   :  { %v3637_v34 = vpop.f32.mrb[10].mxu1 }
 0x1d7   :  { %v3638_v59 = vpop.f32.mrb[11].mxu1 }
 0x1d8   :  { %v3639_v42 = vadd.f32 %v3638_v59, %v3637_v34 }
 0x1da   :  { %v1878_v57 = vadd.f32 %v3639_v42, %v1774_v28 }
 0x1ed   :  { %v3672_v6 = vpop.f32.mrb[12].mxu0 }
 0x1ee   :  { %v3673_v31 = vpop.f32.mrb[13].mxu0 }
 0x1ef   :  { %v3674_v33 = vadd.f32 %v3673_v31, %v3672_v6 }
 0x1f1   :  { %v1990_v61 = vadd.f32 %v3674_v33, %v1878_v57 }
 0x1f6   :  { %v3707_v48 = vpop.f32.mrb[12].mxu1 }
 0x1f7   :  { %v3708_v46 = vpop.f32.mrb[13].mxu1 }
 0x1f8   :  { %v3709_v4 = vadd.f32 %v3708_v46, %v3707_v48 }
 0x1fa   :  { %v2222_v49 = vadd.f32 %v3709_v4, %v1990_v61 }
 0x20d   :  { %v3742_v39 = vpop.f32.mrb[14].mxu0 }
 0x20e   :  { %v3743_v26 = vpop.f32.mrb[15].mxu0 }
 0x20f   :  { %v3744_v18 = vadd.f32 %v3743_v26, %v3742_v39 }
 0x211   :  { %v2360_v37 = vadd.f32 %v3744_v18, %v2222_v49 }
 0x216   :  { %v3777_v13 = vpop.f32.mrb[14].mxu1 }
 0x217   :  { %v3778_v23 = vpop.f32.mrb[15].mxu1 }
 0x218   :  { %v3779_v8 = vadd.f32 %v3778_v23, %v3777_v13 }
 0x21a   :  { %v2468_v19 = vadd.f32 %v3779_v8, %v2360_v37 }
 0x22d   :  { %v3812_v36 = vpop.f32.mrb[16].mxu0 }
 0x22e   :  { %v3813_v38 = vpop.f32.mrb[17].mxu0 }
 0x22f   :  { %v3814_v27 = vadd.f32 %v3813_v38, %v3812_v36 }
 0x231   :  { %v2636_v17 = vadd.f32 %v3814_v27, %v2468_v19 }
 0x236   :  { %v3847_v1 = vpop.f32.mrb[16].mxu1 }
 0x237   :  { %v3848_v60 = vpop.f32.mrb[17].mxu1 }
 0x238   :  { %v3849_v44 = vadd.f32 %v3848_v60, %v3847_v1 }
 0x23a   :  { %v2740_v32 = vadd.f32 %v3849_v44, %v2636_v17 }
 0x241   :  { %v3198_v0 = vpop.f32.mrb[18].mxu0 }
 0x242   :  { %v3909_v58 = vpop.f32.mrb[19].mxu0 }
 0x24a   :  { %v2973_v22 = vpop.f32.mrb[18].mxu1 }
 0x24b   :  { %v4504_v56 = vadd.f32 %v2973_v22, %v2740_v32  ;;  %v3888_v12 = vpop.f32.mrb[19].mxu1 }
 0x24d   :  { %v4505_v14 = vadd.f32 %v4504_v56, %v3198_v0 }
 0x24f   :  { %3202 = vst [vmem:[#allocation7] sm:$0xff] %v4505_v14 }
 0x250   :  { %4577 = shalt.err (!%p4574_p6)
}
 0x251   :  { %s4578_s15 = scalar_lea.hbm %s6001_s3, 128 }
 0x252   :  { %p4579_p7 = scmp.ne.s32.totalorder %s6001_s3, %s4578_s15  ;;  %p4582_p8 = scmp.lt.u32.totalorder %s4578_s15, %s6001_s3 }
 0x254   :  { %p4584_p9 = pnand %p4582_p8, %p4579_p7 }
 0x256   :  { %4587 = shalt.err (!%p4584_p9)
}
 0x257   :  { %3212 = dma.vmem_to_hbm [thread:$0]  %s3210_s11, 128, %s6001_s3, [#allocation4]  }
 0x258   :  { %4592 = dma.done.wait [#allocation4], 128  }
 0x259   :  { %4593 = vsyncadd [#allocation4], 4294967168 }
 0x25a   :  { %3216 = vsyncpa [#allocation3], 1 }
 0x25b   :  { %3217 = vsyncpa [#allocation6], 1 }
 0x25c   :  { %3218 = vsyncpa [#allocation4], 1 }

</bundles_post_ra>
